<compile_context>
chip_gen: v6e
topology: v6e:2x2x1
jax: 0.10.0
libtpu: 0.0.40
codegen_flags: <defaults>
</compile_context>

<pallas_src>
import jax
import jax.numpy as jnp
from jax.experimental import pallas as pl
from jax.experimental.pallas import tpu as pltpu


# ----------------------------------------------------------------------------
# Block-size helpers
# ----------------------------------------------------------------------------
def _pick_time_block(T, max_tc=16):
    """Largest divisor of T that is <= max_tc (kept small so the inner loop fully unrolls)."""
    for tc in range(min(T, max_tc), 0, -1):
        if T % tc == 0:
            return tc
    return 1


def _pick_batch_block(B):
    """Split batch into two sublane-aligned shards (v7x megacore) when possible."""
    if B % 16 == 0:
        return B // 2
    return B


def _pick_row_block(M, max_rows=512):
    if M <= max_rows:
        return M
    for cand in (512, 256, 128, 64, 32, 16, 8):
        if M % cand == 0:
            return cand
    return M


# ----------------------------------------------------------------------------
# Kernel 1: input projection for all timesteps:  gates_x = X @ W_i3 + b_i3
#   X is the (T*B, Din) flattened input (bf16), W_i3 is (Din, 3H) bf16.
# ----------------------------------------------------------------------------
def _in_proj_kernel(x_ref, w_ref, b_ref, o_ref):
    o_ref[...] = (jnp.dot(x_ref[...], w_ref[...],
                          preferred_element_type=jnp.float32)
                  + b_ref[...]).astype(o_ref.dtype)


def input_projection(x_tbd, w_i3_t, b_i3):
    """x_tbd: (T, B, Din) bf16 -> gates_x: (T, B, 3H) f32 (input biases included)."""
    T, B, Din = x_tbd.shape
    H3 = w_i3_t.shape[1]
    M = T * B
    bm = _pick_row_block(M)
    x2 = x_tbd.reshape(M, Din)

    out = pl.pallas_call(
        _in_proj_kernel,
        grid_spec=pltpu.PrefetchScalarGridSpec(
            num_scalar_prefetch=0,
            grid=(M // bm,),
            in_specs=[
                pl.BlockSpec((bm, Din), lambda i: (i, 0)),
                pl.BlockSpec((Din, H3), lambda i: (0, 0)),
                pl.BlockSpec((1, H3), lambda i: (0, 0)),
            ],
            out_specs=pl.BlockSpec((bm, H3), lambda i: (i, 0)),
        ),
        out_shape=jax.ShapeDtypeStruct((M, H3), jnp.float32),
        compiler_params=pltpu.CompilerParams(dimension_semantics=("parallel",)),
    )(x2, w_i3_t, b_i3)
    return out.reshape(T, B, H3)


# ----------------------------------------------------------------------------
# Kernel 2: recurrence.  One fused bf16 (B,H)@(H,3H) matmul per step.
#   gx_ref : (Tc, Bb, 3H) f32  precomputed input gates (biases included)
#   wh_ref : (H, 3H)       bf16 fused [W_hr | W_hz | W_hn]^T
#   bh_ref : (1, 3H)       f32  fused hidden biases
# ----------------------------------------------------------------------------
def _gru_steps(gx_ref, wh_ref, bh_ref, h_scratch, seq_ref):
    H = h_scratch.shape[-1]
    Tc = gx_ref.shape[0]
    wh = wh_ref[...]          # hoisted: loaded once per grid step
    bh = bh_ref[...]

    def step(s, h):
        # single fused recurrent matmul on the MXU, f32 accumulation
        hg = jnp.dot(h.astype(wh.dtype), wh,
                     preferred_element_type=jnp.float32) + bh
        gx = gx_ref[s]                                   # (Bb, 3H) f32
        r = jax.nn.sigmoid(gx[:, 0:H] + hg[:, 0:H])
        z = jax.nn.sigmoid(gx[:, H:2 * H] + hg[:, H:2 * H])
        n = jnp.tanh(gx[:, 2 * H:3 * H] + r * hg[:, 2 * H:3 * H])
        h_new = (1.0 - z) * n + z * h
        if seq_ref is not None:
            seq_ref[s] = h_new.astype(seq_ref.dtype)
        return h_new

    h_final = jax.lax.fori_loop(0, Tc, step, h_scratch[...], unroll=True)
    h_scratch[...] = h_final
    return h_final


def _gru_rec_kernel(gx_ref, h0_ref, wh_ref, bh_ref, seq_ref, hT_ref, h_scratch):
    t = pl.program_id(1)

    @pl.when(t == 0)
    def _():
        h_scratch[...] = h0_ref[...].astype(jnp.float32)

    h_final = _gru_steps(gx_ref, wh_ref, bh_ref, h_scratch, seq_ref)

    @pl.when(t == pl.num_programs(1) - 1)
    def _():
        hT_ref[...] = h_final.astype(hT_ref.dtype)


def _gru_rec_fc_kernel(gx_ref, h0_ref, wh_ref, bh_ref, fcw_ref, fcb_ref,
                       hT_ref, out_ref, h_scratch):
    # Top layer: no sequence output; FC fused into the last time block.
    t = pl.program_id(1)

    @pl.when(t == 0)
    def _():
        h_scratch[...] = h0_ref[...].astype(jnp.float32)

    h_final = _gru_steps(gx_ref, wh_ref, bh_ref, h_scratch, seq_ref=None)

    @pl.when(t == pl.num_programs(1) - 1)
    def _():
        hT_ref[...] = h_final.astype(hT_ref.dtype)
        out_ref[...] = (jnp.dot(h_final, fcw_ref[...],
                                preferred_element_type=jnp.float32)
                        + fcb_ref[...]).astype(out_ref.dtype)


def _rec_grid_common(T, B, H, H3):
    Tc = _pick_time_block(T)
    Bb = _pick_batch_block(B)
    grid = (B // Bb, T // Tc)
    in_specs = [
        pl.BlockSpec((Tc, Bb, H3), lambda b, t: (t, b, 0)),   # gates_x block
        pl.BlockSpec((Bb, H), lambda b, t: (b, 0)),            # h0
        pl.BlockSpec((H, H3), lambda b, t: (0, 0)),            # fused W_hh^T
        pl.BlockSpec((1, H3), lambda b, t: (0, 0)),            # fused b_hh
    ]
    scratch = [pltpu.VMEM((Bb, H), jnp.float32)]
    return Tc, Bb, grid, in_specs, scratch


def gru_recurrence(gates_x, h0, w_h3_t, b_h3):
    """Non-top layer: returns (seq (T,B,H) bf16, hT (B,H) f32)."""
    T, B, H3 = gates_x.shape
    H = H3 // 3
    Tc, Bb, grid, in_specs, scratch = _rec_grid_common(T, B, H, H3)

    seq, hT = pl.pallas_call(
        _gru_rec_kernel,
        grid_spec=pltpu.PrefetchScalarGridSpec(
            num_scalar_prefetch=0,
            grid=grid,
            in_specs=in_specs,
            out_specs=[
                pl.BlockSpec((Tc, Bb, H), lambda b, t: (t, b, 0)),
                pl.BlockSpec((Bb, H), lambda b, t: (b, 0)),
            ],
            scratch_shapes=scratch,
        ),
        out_shape=(
            jax.ShapeDtypeStruct((T, B, H), jnp.bfloat16),   # inter-layer activations in bf16
            jax.ShapeDtypeStruct((B, H), jnp.float32),
        ),
        compiler_params=pltpu.CompilerParams(
            dimension_semantics=("parallel", "arbitrary")),
    )(gates_x, h0, w_h3_t, b_h3)
    return seq, hT


def gru_recurrence_fc(gates_x, h0, w_h3_t, b_h3, fc_w_t, fc_b):
    """Top layer: returns (hT (B,H) f32, logits (B,C) f32); FC fused, no seq output."""
    T, B, H3 = gates_x.shape
    H = H3 // 3
    C = fc_w_t.shape[1]
    Tc, Bb, grid, in_specs, scratch = _rec_grid_common(T, B, H, H3)
    in_specs = in_specs + [
        pl.BlockSpec((H, C), lambda b, t: (0, 0)),             # fc weight
        pl.BlockSpec((1, C), lambda b, t: (0, 0)),             # fc bias
    ]

    hT, out = pl.pallas_call(
        _gru_rec_fc_kernel,
        grid_spec=pltpu.PrefetchScalarGridSpec(
            num_scalar_prefetch=0,
            grid=grid,
            in_specs=in_specs,
            out_specs=[
                pl.BlockSpec((Bb, H), lambda b, t: (b, 0)),
                pl.BlockSpec((Bb, C), lambda b, t: (b, 0)),
            ],
            scratch_shapes=scratch,
        ),
        out_shape=(
            jax.ShapeDtypeStruct((B, H), jnp.float32),
            jax.ShapeDtypeStruct((B, C), jnp.float32),
        ),
        compiler_params=pltpu.CompilerParams(
            dimension_semantics=("parallel", "arbitrary")),
    )(gates_x, h0, w_h3_t, b_h3, fc_w_t, fc_b)
    return hT, out


# ----------------------------------------------------------------------------
# Parameters (mirrors the PyTorch module init: weights U(-a, a), biases 0,
# nn.Linear default init).  Weights stored fused+transposed: W_i3^T (Din, 3H),
# W_h3^T (H, 3H), gate column order [r | z | n].
# ----------------------------------------------------------------------------
def init_params(key, input_size, hidden_size, num_layers, num_classes, a=0.1):
    H = hidden_size
    layers = []
    for layer in range(num_layers):
        d_in = input_size if layer == 0 else H
        key, k1, k2 = jax.random.split(key, 3)
        w_ih = jax.random.uniform(k1, (3 * H, d_in), jnp.float32, -a, a)
        w_hh = jax.random.uniform(k2, (3 * H, H), jnp.float32, -a, a)
        layers.append(dict(
            w_i3_t=w_ih.T,                                  # (d_in, 3H)
            w_h3_t=w_hh.T,                                  # (H, 3H)
            b_i3=jnp.zeros((1, 3 * H), jnp.float32),
            b_h3=jnp.zeros((1, 3 * H), jnp.float32),
        ))
    key, k1, k2 = jax.random.split(key, 3)
    bound = 1.0 / float(H) ** 0.5
    fc_w = jax.random.uniform(k1, (num_classes, H), jnp.float32, -bound, bound)
    fc_b = jax.random.uniform(k2, (num_classes,), jnp.float32, -bound, bound)
    return dict(layers=layers, fc_w_t=fc_w.T, fc_b=fc_b.reshape(1, num_classes))


# ----------------------------------------------------------------------------
# Full forward: matches GRU.forward(x, h) -> (fc(out[:, -1, :]), ht)
# ----------------------------------------------------------------------------
def _gru_forward_impl(x, h0, params):
    # x: (B, T, D) ; h0: (num_layers, B, H)
    x_tbd = jnp.transpose(x, (1, 0, 2))                     # time-major
    layer_in = x_tbd.astype(jnp.bfloat16)                   # bf16 activations for the MXU
    num_layers = len(params["layers"])
    hts = []
    logits = None
    for l, p in enumerate(params["layers"]):
        gates_x = input_projection(layer_in,
                                   p["w_i3_t"].astype(jnp.bfloat16),
                                   p["b_i3"])
        if l == num_layers - 1:
            hT, logits = gru_recurrence_fc(gates_x, h0[l],
                                           p["w_h3_t"].astype(jnp.bfloat16),
                                           p["b_h3"],
                                           params["fc_w_t"], params["fc_b"])
        else:
            seq, hT = gru_recurrence(gates_x, h0[l],
                                     p["w_h3_t"].astype(jnp.bfloat16),
                                     p["b_h3"])
            layer_in = seq                                   # bf16 (T, B, H)
        hts.append(hT)
    ht = jnp.stack(hts, axis=0)                              # (num_layers, B, H)
    return logits, ht


gru_forward = jax.jit(_gru_forward_impl)


# ----------------------------------------------------------------------------
# Pure-JAX f32 reference (PyTorch semantics) for validation
# ----------------------------------------------------------------------------
def gru_forward_ref(x, h0, params):
    B, T, _ = x.shape
    H = h0.shape[-1]
    layer_in = x.astype(jnp.float32)
    hts = []
    for l, p in enumerate(params["layers"]):
        h = h0[l]
        outs = []
        for t in range(T):
            xt = layer_in[:, t, :]
            gi = xt @ p["w_i3_t"] + p["b_i3"]
            gh = h @ p["w_h3_t"] + p["b_h3"]
            r = jax.nn.sigmoid(gi[:, :H] + gh[:, :H])
            z = jax.nn.sigmoid(gi[:, H:2 * H] + gh[:, H:2 * H])
            n = jnp.tanh(gi[:, 2 * H:] + r * gh[:, 2 * H:])
            h = (1.0 - z) * n + z * h
            outs.append(h)
        layer_in = jnp.stack(outs, axis=1)
        hts.append(h)
    ht = jnp.stack(hts, axis=0)
    out = layer_in[:, -1, :] @ params["fc_w_t"] + params["fc_b"]
    return out, ht


if __name__ == "__main__":
    B, T = 2, 8
    input_size, hidden_size, num_layers, num_classes = 16, 32, 2, 10

    key = jax.random.PRNGKey(0)
    kx, kp = jax.random.split(key)
    x = jax.random.normal(kx, (B, T, input_size), jnp.float32)
    params = init_params(kp, input_size, hidden_size, num_layers, num_classes, a=0.1)
    h0 = jnp.zeros((num_layers, B, hidden_size), jnp.float32)   # h is None -> zeros

    out, ht = gru_forward(x, h0, params)
    jax.block_until_ready((out, ht))

    out_ref, ht_ref = gru_forward_ref(x, h0, params)
    assert out.shape == (B, num_classes)
    assert ht.shape == (num_layers, B, hidden_size)
    # bf16 weights/activations on the MXU (f32 accumulation) -> small numeric delta vs f32 ref
    assert jnp.allclose(out, out_ref, atol=2e-2, rtol=2e-2)
    assert jnp.allclose(ht, ht_ref, atol=2e-2, rtol=2e-2)

    print("KERNEL_OK")
</pallas_src>

<mosaic_0001>
module attributes {stable_mosaic.version = 11 : i64} {
  func.func @_in_proj_kernel(%arg0: i32, %arg1: memref<16x16xbf16, #tpu.memory_space<vmem>>, %arg2: memref<16x96xbf16, #tpu.memory_space<vmem>>, %arg3: memref<1x96xf32, #tpu.memory_space<vmem>>, %arg4: memref<16x96xf32, #tpu.memory_space<vmem>>) attributes {dimension_semantics = [#tpu.dimension_semantics<parallel>], iteration_bounds = array<i64: 1>, scalar_prefetch = 0 : i64, scratch_operands = 0 : i64, tpu.core_type = #tpu.core_type<tc>, window_params = [{transform_indices = @transform_0, window_bounds = array<i64: 16, 16>}, {pipeline_mode = #tpu.pipeline_mode<synchronous>, transform_indices = @transform_1, window_bounds = array<i64: 16, 96>}, {pipeline_mode = #tpu.pipeline_mode<synchronous>, transform_indices = @transform_2, window_bounds = array<i64: 1, 96>}, {transform_indices = @transform_3, window_bounds = array<i64: 16, 96>}]} {
    %c0 = arith.constant 0 : index
    %c0_0 = arith.constant 0 : index
    %0 = vector.load %arg1[%c0, %c0_0] : memref<16x16xbf16, #tpu.memory_space<vmem>>, vector<16x16xbf16>
    %c0_1 = arith.constant 0 : index
    %c0_2 = arith.constant 0 : index
    %1 = vector.load %arg2[%c0_1, %c0_2] : memref<16x96xbf16, #tpu.memory_space<vmem>>, vector<16x96xbf16>
    %cst = arith.constant dense<0.000000e+00> : vector<16x96xf32>
    %2 = tpu.matmul %0, %1, %cst {dimension_numbers = #tpu.dot_dimension_numbers<[1], [0], [0], [1], [0, 0, 1, 1], [], []>} : vector<16x16xbf16>, vector<16x96xbf16>, vector<16x96xf32> -> vector<16x96xf32>
    %c0_3 = arith.constant 0 : index
    %c0_4 = arith.constant 0 : index
    %3 = vector.load %arg3[%c0_3, %c0_4] : memref<1x96xf32, #tpu.memory_space<vmem>>, vector<1x96xf32>
    %4 = vector.broadcast %3 : vector<1x96xf32> to vector<16x96xf32>
    %5 = arith.addf %2, %4 : vector<16x96xf32>
    %c0_5 = arith.constant 0 : index
    %c0_6 = arith.constant 0 : index
    %6 = vector.load %arg4[%c0_5, %c0_6] : memref<16x96xf32, #tpu.memory_space<vmem>>, vector<16x96xf32>
    tpu.vector_store %arg4[%c0_5, %c0_6], %5 {strides = array<i32>} : memref<16x96xf32, #tpu.memory_space<vmem>>, vector<16x96xf32>,
    return
  }
  func.func @transform_0(%arg0: i32) -> (i32, i32) {
    %c0_i32 = arith.constant 0 : i32
    %c0_i32_0 = arith.constant 0 : i32
    return %arg0, %c0_i32 : i32, i32
  }
  func.func @transform_1(%arg0: i32) -> (i32, i32) {
    %c0_i32 = arith.constant 0 : i32
    %c0_i32_0 = arith.constant 0 : i32
    %c0_i32_1 = arith.constant 0 : i32
    return %c0_i32, %c0_i32_0 : i32, i32
  }
  func.func @transform_2(%arg0: i32) -> (i32, i32) {
    %c0_i32 = arith.constant 0 : i32
    %c0_i32_0 = arith.constant 0 : i32
    %c0_i32_1 = arith.constant 0 : i32
    return %c0_i32, %c0_i32_0 : i32, i32
  }
  func.func @transform_3(%arg0: i32) -> (i32, i32) {
    %c0_i32 = arith.constant 0 : i32
    %c0_i32_0 = arith.constant 0 : i32
    return %arg0, %c0_i32 : i32, i32
  }
}

module attributes {stable_mosaic.version = 11 : i64} {
  func.func @_in_proj_kernel(%arg0: i32, %arg1: memref<16x32xbf16, #tpu.memory_space<vmem>>, %arg2: memref<32x96xbf16, #tpu.memory_space<vmem>>, %arg3: memref<1x96xf32, #tpu.memory_space<vmem>>, %arg4: memref<16x96xf32, #tpu.memory_space<vmem>>) attributes {dimension_semantics = [#tpu.dimension_semantics<parallel>], iteration_bounds = array<i64: 1>, scalar_prefetch = 0 : i64, scratch_operands = 0 : i64, tpu.core_type = #tpu.core_type<tc>, window_params = [{transform_indices = @transform_0, window_bounds = array<i64: 16, 32>}, {pipeline_mode = #tpu.pipeline_mode<synchronous>, transform_indices = @transform_1, window_bounds = array<i64: 32, 96>}, {pipeline_mode = #tpu.pipeline_mode<synchronous>, transform_indices = @transform_2, window_bounds = array<i64: 1, 96>}, {transform_indices = @transform_3, window_bounds = array<i64: 16, 96>}]} {
    %c0 = arith.constant 0 : index
    %c0_0 = arith.constant 0 : index
    %0 = vector.load %arg1[%c0, %c0_0] : memref<16x32xbf16, #tpu.memory_space<vmem>>, vector<16x32xbf16>
    %c0_1 = arith.constant 0 : index
    %c0_2 = arith.constant 0 : index
    %1 = vector.load %arg2[%c0_1, %c0_2] : memref<32x96xbf16, #tpu.memory_space<vmem>>, vector<32x96xbf16>
    %cst = arith.constant dense<0.000000e+00> : vector<16x96xf32>
    %2 = tpu.matmul %0, %1, %cst {dimension_numbers = #tpu.dot_dimension_numbers<[1], [0], [0], [1], [0, 0, 1, 1], [], []>} : vector<16x32xbf16>, vector<32x96xbf16>, vector<16x96xf32> -> vector<16x96xf32>
    %c0_3 = arith.constant 0 : index
    %c0_4 = arith.constant 0 : index
    %3 = vector.load %arg3[%c0_3, %c0_4] : memref<1x96xf32, #tpu.memory_space<vmem>>, vector<1x96xf32>
    %4 = vector.broadcast %3 : vector<1x96xf32> to vector<16x96xf32>
    %5 = arith.addf %2, %4 : vector<16x96xf32>
    %c0_5 = arith.constant 0 : index
    %c0_6 = arith.constant 0 : index
    %6 = vector.load %arg4[%c0_5, %c0_6] : memref<16x96xf32, #tpu.memory_space<vmem>>, vector<16x96xf32>
    tpu.vector_store %arg4[%c0_5, %c0_6], %5 {strides = array<i32>} : memref<16x96xf32, #tpu.memory_space<vmem>>, vector<16x96xf32>,
    return
  }
  func.func @transform_0(%arg0: i32) -> (i32, i32) {
    %c0_i32 = arith.constant 0 : i32
    %c0_i32_0 = arith.constant 0 : i32
    return %arg0, %c0_i32 : i32, i32
  }
  func.func @transform_1(%arg0: i32) -> (i32, i32) {
    %c0_i32 = arith.constant 0 : i32
    %c0_i32_0 = arith.constant 0 : i32
    %c0_i32_1 = arith.constant 0 : i32
    return %c0_i32, %c0_i32_0 : i32, i32
  }
  func.func @transform_2(%arg0: i32) -> (i32, i32) {
    %c0_i32 = arith.constant 0 : i32
    %c0_i32_0 = arith.constant 0 : i32
    %c0_i32_1 = arith.constant 0 : i32
    return %c0_i32, %c0_i32_0 : i32, i32
  }
  func.func @transform_3(%arg0: i32) -> (i32, i32) {
    %c0_i32 = arith.constant 0 : i32
    %c0_i32_0 = arith.constant 0 : i32
    return %arg0, %c0_i32 : i32, i32
  }
}

module attributes {stable_mosaic.version = 11 : i64} {
  func.func @_gru_rec_kernel(%arg0: i32, %arg1: i32, %arg2: memref<8x2x96xf32, #tpu.memory_space<vmem>>, %arg3: memref<2x32xf32, #tpu.memory_space<vmem>>, %arg4: memref<32x96xbf16, #tpu.memory_space<vmem>>, %arg5: memref<1x96xf32, #tpu.memory_space<vmem>>, %arg6: memref<8x2x32xbf16, #tpu.memory_space<vmem>>, %arg7: memref<2x32xf32, #tpu.memory_space<vmem>>, %arg8: memref<2x32xf32, #tpu.memory_space<vmem>>) attributes {dimension_semantics = [#tpu.dimension_semantics<parallel>, #tpu.dimension_semantics<arbitrary>], iteration_bounds = array<i64: 1, 1>, scalar_prefetch = 0 : i64, scratch_operands = 1 : i64, tpu.core_type = #tpu.core_type<tc>, window_params = [{transform_indices = @transform_0, window_bounds = array<i64: 8, 2, 96>}, {transform_indices = @transform_1, window_bounds = array<i64: 2, 32>}, {pipeline_mode = #tpu.pipeline_mode<synchronous>, transform_indices = @transform_2, window_bounds = array<i64: 32, 96>}, {pipeline_mode = #tpu.pipeline_mode<synchronous>, transform_indices = @transform_3, window_bounds = array<i64: 1, 96>}, {transform_indices = @transform_4, window_bounds = array<i64: 8, 2, 32>}, {transform_indices = @transform_5, window_bounds = array<i64: 2, 32>}]} {
    %c0_i32 = arith.constant 0 : i32
    %0 = arith.cmpi eq, %arg1, %c0_i32 : i32
    %1 = arith.extui %0 : i1 to i32
    %c0_i32_0 = arith.constant 0 : i32
    %2 = arith.cmpi ne, %1, %c0_i32_0 : i32
    scf.if %2 {
      %c0_74 = arith.constant 0 : index
      %c0_75 = arith.constant 0 : index
      %314 = vector.load %arg3[%c0_74, %c0_75] : memref<2x32xf32, #tpu.memory_space<vmem>>, vector<2x32xf32>
      %c0_76 = arith.constant 0 : index
      %c0_77 = arith.constant 0 : index
      %315 = vector.load %arg8[%c0_76, %c0_77] : memref<2x32xf32, #tpu.memory_space<vmem>>, vector<2x32xf32>
      tpu.vector_store %arg8[%c0_76, %c0_77], %314 {strides = array<i32>} : memref<2x32xf32, #tpu.memory_space<vmem>>, vector<2x32xf32>,
    } else {
    }
    %c0 = arith.constant 0 : index
    %c0_1 = arith.constant 0 : index
    %3 = vector.load %arg4[%c0, %c0_1] : memref<32x96xbf16, #tpu.memory_space<vmem>>, vector<32x96xbf16>
    %c0_2 = arith.constant 0 : index
    %c0_3 = arith.constant 0 : index
    %4 = vector.load %arg5[%c0_2, %c0_3] : memref<1x96xf32, #tpu.memory_space<vmem>>, vector<1x96xf32>
    %c0_4 = arith.constant 0 : index
    %c0_5 = arith.constant 0 : index
    %5 = vector.load %arg8[%c0_4, %c0_5] : memref<2x32xf32, #tpu.memory_space<vmem>>, vector<2x32xf32>
    %c0_i32_6 = arith.constant 0 : i32
    %6 = arith.truncf %5 : vector<2x32xf32> to vector<2x32xbf16>
    %cst = arith.constant dense<0.000000e+00> : vector<2x96xf32>
    %7 = tpu.matmul %6, %3, %cst {dimension_numbers = #tpu.dot_dimension_numbers<[1], [0], [0], [1], [0, 0, 1, 1], [], []>} : vector<2x32xbf16>, vector<32x96xbf16>, vector<2x96xf32> -> vector<2x96xf32>
    %8 = vector.broadcast %4 : vector<1x96xf32> to vector<2x96xf32>
    %9 = arith.addf %7, %8 : vector<2x96xf32>
    %10 = arith.index_cast %c0_i32_6 : i32 to index
    %c0_7 = arith.constant 0 : index
    %c0_8 = arith.constant 0 : index
    %11 = vector.load %arg2[%10, %c0_7, %c0_8] : memref<8x2x96xf32, #tpu.memory_space<vmem>>, vector<1x2x96xf32>
    %12 = vector.shape_cast %11 : vector<1x2x96xf32> to vector<2x96xf32>
    %13 = vector.extract_strided_slice %12 {offsets = [0, 0], sizes = [2, 32], strides = [1, 1]} : vector<2x96xf32> to vector<2x32xf32>
    %14 = vector.extract_strided_slice %9 {offsets = [0, 0], sizes = [2, 32], strides = [1, 1]} : vector<2x96xf32> to vector<2x32xf32>
    %15 = arith.addf %13, %14 : vector<2x32xf32>
    %16 = arith.negf %15 : vector<2x32xf32>
    %17 = math.exp %16 : vector<2x32xf32>
    %cst_9 = arith.constant 1.000000e+00 : f32
    %18 = vector.broadcast %cst_9 : f32 to vector<2x32xf32>
    %19 = arith.addf %18, %17 : vector<2x32xf32>
    %20 = arith.divf %18, %19 : vector<2x32xf32>
    %21 = vector.extract_strided_slice %12 {offsets = [0, 32], sizes = [2, 32], strides = [1, 1]} : vector<2x96xf32> to vector<2x32xf32>
    %22 = vector.extract_strided_slice %9 {offsets = [0, 32], sizes = [2, 32], strides = [1, 1]} : vector<2x96xf32> to vector<2x32xf32>
    %23 = arith.addf %21, %22 : vector<2x32xf32>
    %24 = arith.negf %23 : vector<2x32xf32>
    %25 = math.exp %24 : vector<2x32xf32>
    %cst_10 = arith.constant 1.000000e+00 : f32
    %26 = vector.broadcast %cst_10 : f32 to vector<2x32xf32>
    %27 = arith.addf %26, %25 : vector<2x32xf32>
    %28 = arith.divf %26, %27 : vector<2x32xf32>
    %29 = vector.extract_strided_slice %12 {offsets = [0, 64], sizes = [2, 32], strides = [1, 1]} : vector<2x96xf32> to vector<2x32xf32>
    %30 = vector.extract_strided_slice %9 {offsets = [0, 64], sizes = [2, 32], strides = [1, 1]} : vector<2x96xf32> to vector<2x32xf32>
    %31 = arith.mulf %20, %30 : vector<2x32xf32>
    %32 = arith.addf %29, %31 : vector<2x32xf32>
    %33 = math.tanh %32 : vector<2x32xf32>
    %cst_11 = arith.constant 1.000000e+00 : f32
    %34 = vector.broadcast %cst_11 : f32 to vector<2x32xf32>
    %35 = arith.subf %34, %28 : vector<2x32xf32>
    %36 = arith.mulf %35, %33 : vector<2x32xf32>
    %37 = arith.mulf %28, %5 : vector<2x32xf32>
    %38 = arith.addf %36, %37 : vector<2x32xf32>
    %39 = arith.truncf %38 : vector<2x32xf32> to vector<2x32xbf16>
    %40 = arith.index_cast %c0_i32_6 : i32 to index
    %c0_12 = arith.constant 0 : index
    %c0_13 = arith.constant 0 : index
    %41 = vector.load %arg6[%40, %c0_12, %c0_13] : memref<8x2x32xbf16, #tpu.memory_space<vmem>>, vector<1x2x32xbf16>
    %42 = vector.shape_cast %41 : vector<1x2x32xbf16> to vector<2x32xbf16>
    %43 = vector.shape_cast %39 : vector<2x32xbf16> to vector<1x2x32xbf16>
    tpu.vector_store %arg6[%40, %c0_12, %c0_13], %43 {strides = array<i32>} : memref<8x2x32xbf16, #tpu.memory_space<vmem>>, vector<1x2x32xbf16>,
    %c1_i32 = arith.constant 1 : i32
    %44 = arith.truncf %38 : vector<2x32xf32> to vector<2x32xbf16>
    %cst_14 = arith.constant dense<0.000000e+00> : vector<2x96xf32>
    %45 = tpu.matmul %44, %3, %cst_14 {dimension_numbers = #tpu.dot_dimension_numbers<[1], [0], [0], [1], [0, 0, 1, 1], [], []>} : vector<2x32xbf16>, vector<32x96xbf16>, vector<2x96xf32> -> vector<2x96xf32>
    %46 = vector.broadcast %4 : vector<1x96xf32> to vector<2x96xf32>
    %47 = arith.addf %45, %46 : vector<2x96xf32>
    %48 = arith.index_cast %c1_i32 : i32 to index
    %c0_15 = arith.constant 0 : index
    %c0_16 = arith.constant 0 : index
    %49 = vector.load %arg2[%48, %c0_15, %c0_16] : memref<8x2x96xf32, #tpu.memory_space<vmem>>, vector<1x2x96xf32>
    %50 = vector.shape_cast %49 : vector<1x2x96xf32> to vector<2x96xf32>
    %51 = vector.extract_strided_slice %50 {offsets = [0, 0], sizes = [2, 32], strides = [1, 1]} : vector<2x96xf32> to vector<2x32xf32>
    %52 = vector.extract_strided_slice %47 {offsets = [0, 0], sizes = [2, 32], strides = [1, 1]} : vector<2x96xf32> to vector<2x32xf32>
    %53 = arith.addf %51, %52 : vector<2x32xf32>
    %54 = arith.negf %53 : vector<2x32xf32>
    %55 = math.exp %54 : vector<2x32xf32>
    %cst_17 = arith.constant 1.000000e+00 : f32
    %56 = vector.broadcast %cst_17 : f32 to vector<2x32xf32>
    %57 = arith.addf %56, %55 : vector<2x32xf32>
    %58 = arith.divf %56, %57 : vector<2x32xf32>
    %59 = vector.extract_strided_slice %50 {offsets = [0, 32], sizes = [2, 32], strides = [1, 1]} : vector<2x96xf32> to vector<2x32xf32>
    %60 = vector.extract_strided_slice %47 {offsets = [0, 32], sizes = [2, 32], strides = [1, 1]} : vector<2x96xf32> to vector<2x32xf32>
    %61 = arith.addf %59, %60 : vector<2x32xf32>
    %62 = arith.negf %61 : vector<2x32xf32>
    %63 = math.exp %62 : vector<2x32xf32>
    %cst_18 = arith.constant 1.000000e+00 : f32
    %64 = vector.broadcast %cst_18 : f32 to vector<2x32xf32>
    %65 = arith.addf %64, %63 : vector<2x32xf32>
    %66 = arith.divf %64, %65 : vector<2x32xf32>
    %67 = vector.extract_strided_slice %50 {offsets = [0, 64], sizes = [2, 32], strides = [1, 1]} : vector<2x96xf32> to vector<2x32xf32>
    %68 = vector.extract_strided_slice %47 {offsets = [0, 64], sizes = [2, 32], strides = [1, 1]} : vector<2x96xf32> to vector<2x32xf32>
    %69 = arith.mulf %58, %68 : vector<2x32xf32>
    %70 = arith.addf %67, %69 : vector<2x32xf32>
    %71 = math.tanh %70 : vector<2x32xf32>
    %cst_19 = arith.constant 1.000000e+00 : f32
    %72 = vector.broadcast %cst_19 : f32 to vector<2x32xf32>
    %73 = arith.subf %72, %66 : vector<2x32xf32>
    %74 = arith.mulf %73, %71 : vector<2x32xf32>
    %75 = arith.mulf %66, %38 : vector<2x32xf32>
    %76 = arith.addf %74, %75 : vector<2x32xf32>
    %77 = arith.truncf %76 : vector<2x32xf32> to vector<2x32xbf16>
    %78 = arith.index_cast %c1_i32 : i32 to index
    %c0_20 = arith.constant 0 : index
    %c0_21 = arith.constant 0 : index
    %79 = vector.load %arg6[%78, %c0_20, %c0_21] : memref<8x2x32xbf16, #tpu.memory_space<vmem>>, vector<1x2x32xbf16>
    %80 = vector.shape_cast %79 : vector<1x2x32xbf16> to vector<2x32xbf16>
    %81 = vector.shape_cast %77 : vector<2x32xbf16> to vector<1x2x32xbf16>
    tpu.vector_store %arg6[%78, %c0_20, %c0_21], %81 {strides = array<i32>} : memref<8x2x32xbf16, #tpu.memory_space<vmem>>, vector<1x2x32xbf16>,
    %c2_i32 = arith.constant 2 : i32
    %82 = arith.truncf %76 : vector<2x32xf32> to vector<2x32xbf16>
    %cst_22 = arith.constant dense<0.000000e+00> : vector<2x96xf32>
    %83 = tpu.matmul %82, %3, %cst_22 {dimension_numbers = #tpu.dot_dimension_numbers<[1], [0], [0], [1], [0, 0, 1, 1], [], []>} : vector<2x32xbf16>, vector<32x96xbf16>, vector<2x96xf32> -> vector<2x96xf32>
    %84 = vector.broadcast %4 : vector<1x96xf32> to vector<2x96xf32>
    %85 = arith.addf %83, %84 : vector<2x96xf32>
    %86 = arith.index_cast %c2_i32 : i32 to index
    %c0_23 = arith.constant 0 : index
    %c0_24 = arith.constant 0 : index
    %87 = vector.load %arg2[%86, %c0_23, %c0_24] : memref<8x2x96xf32, #tpu.memory_space<vmem>>, vector<1x2x96xf32>
    %88 = vector.shape_cast %87 : vector<1x2x96xf32> to vector<2x96xf32>
    %89 = vector.extract_strided_slice %88 {offsets = [0, 0], sizes = [2, 32], strides = [1, 1]} : vector<2x96xf32> to vector<2x32xf32>
    %90 = vector.extract_strided_slice %85 {offsets = [0, 0], sizes = [2, 32], strides = [1, 1]} : vector<2x96xf32> to vector<2x32xf32>
    %91 = arith.addf %89, %90 : vector<2x32xf32>
    %92 = arith.negf %91 : vector<2x32xf32>
    %93 = math.exp %92 : vector<2x32xf32>
    %cst_25 = arith.constant 1.000000e+00 : f32
    %94 = vector.broadcast %cst_25 : f32 to vector<2x32xf32>
    %95 = arith.addf %94, %93 : vector<2x32xf32>
    %96 = arith.divf %94, %95 : vector<2x32xf32>
    %97 = vector.extract_strided_slice %88 {offsets = [0, 32], sizes = [2, 32], strides = [1, 1]} : vector<2x96xf32> to vector<2x32xf32>
    %98 = vector.extract_strided_slice %85 {offsets = [0, 32], sizes = [2, 32], strides = [1, 1]} : vector<2x96xf32> to vector<2x32xf32>
    %99 = arith.addf %97, %98 : vector<2x32xf32>
    %100 = arith.negf %99 : vector<2x32xf32>
    %101 = math.exp %100 : vector<2x32xf32>
    %cst_26 = arith.constant 1.000000e+00 : f32
    %102 = vector.broadcast %cst_26 : f32 to vector<2x32xf32>
    %103 = arith.addf %102, %101 : vector<2x32xf32>
    %104 = arith.divf %102, %103 : vector<2x32xf32>
    %105 = vector.extract_strided_slice %88 {offsets = [0, 64], sizes = [2, 32], strides = [1, 1]} : vector<2x96xf32> to vector<2x32xf32>
    %106 = vector.extract_strided_slice %85 {offsets = [0, 64], sizes = [2, 32], strides = [1, 1]} : vector<2x96xf32> to vector<2x32xf32>
    %107 = arith.mulf %96, %106 : vector<2x32xf32>
    %108 = arith.addf %105, %107 : vector<2x32xf32>
    %109 = math.tanh %108 : vector<2x32xf32>
    %cst_27 = arith.constant 1.000000e+00 : f32
    %110 = vector.broadcast %cst_27 : f32 to vector<2x32xf32>
    %111 = arith.subf %110, %104 : vector<2x32xf32>
    %112 = arith.mulf %111, %109 : vector<2x32xf32>
    %113 = arith.mulf %104, %76 : vector<2x32xf32>
    %114 = arith.addf %112, %113 : vector<2x32xf32>
    %115 = arith.truncf %114 : vector<2x32xf32> to vector<2x32xbf16>
    %116 = arith.index_cast %c2_i32 : i32 to index
    %c0_28 = arith.constant 0 : index
    %c0_29 = arith.constant 0 : index
    %117 = vector.load %arg6[%116, %c0_28, %c0_29] : memref<8x2x32xbf16, #tpu.memory_space<vmem>>, vector<1x2x32xbf16>
    %118 = vector.shape_cast %117 : vector<1x2x32xbf16> to vector<2x32xbf16>
    %119 = vector.shape_cast %115 : vector<2x32xbf16> to vector<1x2x32xbf16>
    tpu.vector_store %arg6[%116, %c0_28, %c0_29], %119 {strides = array<i32>} : memref<8x2x32xbf16, #tpu.memory_space<vmem>>, vector<1x2x32xbf16>,
    %c3_i32 = arith.constant 3 : i32
    %120 = arith.truncf %114 : vector<2x32xf32> to vector<2x32xbf16>
    %cst_30 = arith.constant dense<0.000000e+00> : vector<2x96xf32>
    %121 = tpu.matmul %120, %3, %cst_30 {dimension_numbers = #tpu.dot_dimension_numbers<[1], [0], [0], [1], [0, 0, 1, 1], [], []>} : vector<2x32xbf16>, vector<32x96xbf16>, vector<2x96xf32> -> vector<2x96xf32>
    %122 = vector.broadcast %4 : vector<1x96xf32> to vector<2x96xf32>
    %123 = arith.addf %121, %122 : vector<2x96xf32>
    %124 = arith.index_cast %c3_i32 : i32 to index
    %c0_31 = arith.constant 0 : index
    %c0_32 = arith.constant 0 : index
    %125 = vector.load %arg2[%124, %c0_31, %c0_32] : memref<8x2x96xf32, #tpu.memory_space<vmem>>, vector<1x2x96xf32>
    %126 = vector.shape_cast %125 : vector<1x2x96xf32> to vector<2x96xf32>
    %127 = vector.extract_strided_slice %126 {offsets = [0, 0], sizes = [2, 32], strides = [1, 1]} : vector<2x96xf32> to vector<2x32xf32>
    %128 = vector.extract_strided_slice %123 {offsets = [0, 0], sizes = [2, 32], strides = [1, 1]} : vector<2x96xf32> to vector<2x32xf32>
    %129 = arith.addf %127, %128 : vector<2x32xf32>
    %130 = arith.negf %129 : vector<2x32xf32>
    %131 = math.exp %130 : vector<2x32xf32>
    %cst_33 = arith.constant 1.000000e+00 : f32
    %132 = vector.broadcast %cst_33 : f32 to vector<2x32xf32>
    %133 = arith.addf %132, %131 : vector<2x32xf32>
    %134 = arith.divf %132, %133 : vector<2x32xf32>
    %135 = vector.extract_strided_slice %126 {offsets = [0, 32], sizes = [2, 32], strides = [1, 1]} : vector<2x96xf32> to vector<2x32xf32>
    %136 = vector.extract_strided_slice %123 {offsets = [0, 32], sizes = [2, 32], strides = [1, 1]} : vector<2x96xf32> to vector<2x32xf32>
    %137 = arith.addf %135, %136 : vector<2x32xf32>
    %138 = arith.negf %137 : vector<2x32xf32>
    %139 = math.exp %138 : vector<2x32xf32>
    %cst_34 = arith.constant 1.000000e+00 : f32
    %140 = vector.broadcast %cst_34 : f32 to vector<2x32xf32>
    %141 = arith.addf %140, %139 : vector<2x32xf32>
    %142 = arith.divf %140, %141 : vector<2x32xf32>
    %143 = vector.extract_strided_slice %126 {offsets = [0, 64], sizes = [2, 32], strides = [1, 1]} : vector<2x96xf32> to vector<2x32xf32>
    %144 = vector.extract_strided_slice %123 {offsets = [0, 64], sizes = [2, 32], strides = [1, 1]} : vector<2x96xf32> to vector<2x32xf32>
    %145 = arith.mulf %134, %144 : vector<2x32xf32>
    %146 = arith.addf %143, %145 : vector<2x32xf32>
    %147 = math.tanh %146 : vector<2x32xf32>
    %cst_35 = arith.constant 1.000000e+00 : f32
    %148 = vector.broadcast %cst_35 : f32 to vector<2x32xf32>
    %149 = arith.subf %148, %142 : vector<2x32xf32>
    %150 = arith.mulf %149, %147 : vector<2x32xf32>
    %151 = arith.mulf %142, %114 : vector<2x32xf32>
    %152 = arith.addf %150, %151 : vector<2x32xf32>
    %153 = arith.truncf %152 : vector<2x32xf32> to vector<2x32xbf16>
    %154 = arith.index_cast %c3_i32 : i32 to index
    %c0_36 = arith.constant 0 : index
    %c0_37 = arith.constant 0 : index
    %155 = vector.load %arg6[%154, %c0_36, %c0_37] : memref<8x2x32xbf16, #tpu.memory_space<vmem>>, vector<1x2x32xbf16>
    %156 = vector.shape_cast %155 : vector<1x2x32xbf16> to vector<2x32xbf16>
    %157 = vector.shape_cast %153 : vector<2x32xbf16> to vector<1x2x32xbf16>
    tpu.vector_store %arg6[%154, %c0_36, %c0_37], %157 {strides = array<i32>} : memref<8x2x32xbf16, #tpu.memory_space<vmem>>, vector<1x2x32xbf16>,
    %c4_i32 = arith.constant 4 : i32
    %158 = arith.truncf %152 : vector<2x32xf32> to vector<2x32xbf16>
    %cst_38 = arith.constant dense<0.000000e+00> : vector<2x96xf32>
    %159 = tpu.matmul %158, %3, %cst_38 {dimension_numbers = #tpu.dot_dimension_numbers<[1], [0], [0], [1], [0, 0, 1, 1], [], []>} : vector<2x32xbf16>, vector<32x96xbf16>, vector<2x96xf32> -> vector<2x96xf32>
    %160 = vector.broadcast %4 : vector<1x96xf32> to vector<2x96xf32>
    %161 = arith.addf %159, %160 : vector<2x96xf32>
    %162 = arith.index_cast %c4_i32 : i32 to index
    %c0_39 = arith.constant 0 : index
    %c0_40 = arith.constant 0 : index
    %163 = vector.load %arg2[%162, %c0_39, %c0_40] : memref<8x2x96xf32, #tpu.memory_space<vmem>>, vector<1x2x96xf32>
    %164 = vector.shape_cast %163 : vector<1x2x96xf32> to vector<2x96xf32>
    %165 = vector.extract_strided_slice %164 {offsets = [0, 0], sizes = [2, 32], strides = [1, 1]} : vector<2x96xf32> to vector<2x32xf32>
    %166 = vector.extract_strided_slice %161 {offsets = [0, 0], sizes = [2, 32], strides = [1, 1]} : vector<2x96xf32> to vector<2x32xf32>
    %167 = arith.addf %165, %166 : vector<2x32xf32>
    %168 = arith.negf %167 : vector<2x32xf32>
    %169 = math.exp %168 : vector<2x32xf32>
    %cst_41 = arith.constant 1.000000e+00 : f32
    %170 = vector.broadcast %cst_41 : f32 to vector<2x32xf32>
    %171 = arith.addf %170, %169 : vector<2x32xf32>
    %172 = arith.divf %170, %171 : vector<2x32xf32>
    %173 = vector.extract_strided_slice %164 {offsets = [0, 32], sizes = [2, 32], strides = [1, 1]} : vector<2x96xf32> to vector<2x32xf32>
    %174 = vector.extract_strided_slice %161 {offsets = [0, 32], sizes = [2, 32], strides = [1, 1]} : vector<2x96xf32> to vector<2x32xf32>
    %175 = arith.addf %173, %174 : vector<2x32xf32>
    %176 = arith.negf %175 : vector<2x32xf32>
    %177 = math.exp %176 : vector<2x32xf32>
    %cst_42 = arith.constant 1.000000e+00 : f32
    %178 = vector.broadcast %cst_42 : f32 to vector<2x32xf32>
    %179 = arith.addf %178, %177 : vector<2x32xf32>
    %180 = arith.divf %178, %179 : vector<2x32xf32>
    %181 = vector.extract_strided_slice %164 {offsets = [0, 64], sizes = [2, 32], strides = [1, 1]} : vector<2x96xf32> to vector<2x32xf32>
    %182 = vector.extract_strided_slice %161 {offsets = [0, 64], sizes = [2, 32], strides = [1, 1]} : vector<2x96xf32> to vector<2x32xf32>
    %183 = arith.mulf %172, %182 : vector<2x32xf32>
    %184 = arith.addf %181, %183 : vector<2x32xf32>
    %185 = math.tanh %184 : vector<2x32xf32>
    %cst_43 = arith.constant 1.000000e+00 : f32
    %186 = vector.broadcast %cst_43 : f32 to vector<2x32xf32>
    %187 = arith.subf %186, %180 : vector<2x32xf32>
    %188 = arith.mulf %187, %185 : vector<2x32xf32>
    %189 = arith.mulf %180, %152 : vector<2x32xf32>
    %190 = arith.addf %188, %189 : vector<2x32xf32>
    %191 = arith.truncf %190 : vector<2x32xf32> to vector<2x32xbf16>
    %192 = arith.index_cast %c4_i32 : i32 to index
    %c0_44 = arith.constant 0 : index
    %c0_45 = arith.constant 0 : index
    %193 = vector.load %arg6[%192, %c0_44, %c0_45] : memref<8x2x32xbf16, #tpu.memory_space<vmem>>, vector<1x2x32xbf16>
    %194 = vector.shape_cast %193 : vector<1x2x32xbf16> to vector<2x32xbf16>
    %195 = vector.shape_cast %191 : vector<2x32xbf16> to vector<1x2x32xbf16>
    tpu.vector_store %arg6[%192, %c0_44, %c0_45], %195 {strides = array<i32>} : memref<8x2x32xbf16, #tpu.memory_space<vmem>>, vector<1x2x32xbf16>,
    %c5_i32 = arith.constant 5 : i32
    %196 = arith.truncf %190 : vector<2x32xf32> to vector<2x32xbf16>
    %cst_46 = arith.constant dense<0.000000e+00> : vector<2x96xf32>
    %197 = tpu.matmul %196, %3, %cst_46 {dimension_numbers = #tpu.dot_dimension_numbers<[1], [0], [0], [1], [0, 0, 1, 1], [], []>} : vector<2x32xbf16>, vector<32x96xbf16>, vector<2x96xf32> -> vector<2x96xf32>
    %198 = vector.broadcast %4 : vector<1x96xf32> to vector<2x96xf32>
    %199 = arith.addf %197, %198 : vector<2x96xf32>
    %200 = arith.index_cast %c5_i32 : i32 to index
    %c0_47 = arith.constant 0 : index
    %c0_48 = arith.constant 0 : index
    %201 = vector.load %arg2[%200, %c0_47, %c0_48] : memref<8x2x96xf32, #tpu.memory_space<vmem>>, vector<1x2x96xf32>
    %202 = vector.shape_cast %201 : vector<1x2x96xf32> to vector<2x96xf32>
    %203 = vector.extract_strided_slice %202 {offsets = [0, 0], sizes = [2, 32], strides = [1, 1]} : vector<2x96xf32> to vector<2x32xf32>
    %204 = vector.extract_strided_slice %199 {offsets = [0, 0], sizes = [2, 32], strides = [1, 1]} : vector<2x96xf32> to vector<2x32xf32>
    %205 = arith.addf %203, %204 : vector<2x32xf32>
    %206 = arith.negf %205 : vector<2x32xf32>
    %207 = math.exp %206 : vector<2x32xf32>
    %cst_49 = arith.constant 1.000000e+00 : f32
    %208 = vector.broadcast %cst_49 : f32 to vector<2x32xf32>
    %209 = arith.addf %208, %207 : vector<2x32xf32>
    %210 = arith.divf %208, %209 : vector<2x32xf32>
    %211 = vector.extract_strided_slice %202 {offsets = [0, 32], sizes = [2, 32], strides = [1, 1]} : vector<2x96xf32> to vector<2x32xf32>
    %212 = vector.extract_strided_slice %199 {offsets = [0, 32], sizes = [2, 32], strides = [1, 1]} : vector<2x96xf32> to vector<2x32xf32>
    %213 = arith.addf %211, %212 : vector<2x32xf32>
    %214 = arith.negf %213 : vector<2x32xf32>
    %215 = math.exp %214 : vector<2x32xf32>
    %cst_50 = arith.constant 1.000000e+00 : f32
    %216 = vector.broadcast %cst_50 : f32 to vector<2x32xf32>
    %217 = arith.addf %216, %215 : vector<2x32xf32>
    %218 = arith.divf %216, %217 : vector<2x32xf32>
    %219 = vector.extract_strided_slice %202 {offsets = [0, 64], sizes = [2, 32], strides = [1, 1]} : vector<2x96xf32> to vector<2x32xf32>
    %220 = vector.extract_strided_slice %199 {offsets = [0, 64], sizes = [2, 32], strides = [1, 1]} : vector<2x96xf32> to vector<2x32xf32>
    %221 = arith.mulf %210, %220 : vector<2x32xf32>
    %222 = arith.addf %219, %221 : vector<2x32xf32>
    %223 = math.tanh %222 : vector<2x32xf32>
    %cst_51 = arith.constant 1.000000e+00 : f32
    %224 = vector.broadcast %cst_51 : f32 to vector<2x32xf32>
    %225 = arith.subf %224, %218 : vector<2x32xf32>
    %226 = arith.mulf %225, %223 : vector<2x32xf32>
    %227 = arith.mulf %218, %190 : vector<2x32xf32>
    %228 = arith.addf %226, %227 : vector<2x32xf32>
    %229 = arith.truncf %228 : vector<2x32xf32> to vector<2x32xbf16>
    %230 = arith.index_cast %c5_i32 : i32 to index
    %c0_52 = arith.constant 0 : index
    %c0_53 = arith.constant 0 : index
    %231 = vector.load %arg6[%230, %c0_52, %c0_53] : memref<8x2x32xbf16, #tpu.memory_space<vmem>>, vector<1x2x32xbf16>
    %232 = vector.shape_cast %231 : vector<1x2x32xbf16> to vector<2x32xbf16>
    %233 = vector.shape_cast %229 : vector<2x32xbf16> to vector<1x2x32xbf16>
    tpu.vector_store %arg6[%230, %c0_52, %c0_53], %233 {strides = array<i32>} : memref<8x2x32xbf16, #tpu.memory_space<vmem>>, vector<1x2x32xbf16>,
    %c6_i32 = arith.constant 6 : i32
    %234 = arith.truncf %228 : vector<2x32xf32> to vector<2x32xbf16>
    %cst_54 = arith.constant dense<0.000000e+00> : vector<2x96xf32>
    %235 = tpu.matmul %234, %3, %cst_54 {dimension_numbers = #tpu.dot_dimension_numbers<[1], [0], [0], [1], [0, 0, 1, 1], [], []>} : vector<2x32xbf16>, vector<32x96xbf16>, vector<2x96xf32> -> vector<2x96xf32>
    %236 = vector.broadcast %4 : vector<1x96xf32> to vector<2x96xf32>
    %237 = arith.addf %235, %236 : vector<2x96xf32>
    %238 = arith.index_cast %c6_i32 : i32 to index
    %c0_55 = arith.constant 0 : index
    %c0_56 = arith.constant 0 : index
    %239 = vector.load %arg2[%238, %c0_55, %c0_56] : memref<8x2x96xf32, #tpu.memory_space<vmem>>, vector<1x2x96xf32>
    %240 = vector.shape_cast %239 : vector<1x2x96xf32> to vector<2x96xf32>
    %241 = vector.extract_strided_slice %240 {offsets = [0, 0], sizes = [2, 32], strides = [1, 1]} : vector<2x96xf32> to vector<2x32xf32>
    %242 = vector.extract_strided_slice %237 {offsets = [0, 0], sizes = [2, 32], strides = [1, 1]} : vector<2x96xf32> to vector<2x32xf32>
    %243 = arith.addf %241, %242 : vector<2x32xf32>
    %244 = arith.negf %243 : vector<2x32xf32>
    %245 = math.exp %244 : vector<2x32xf32>
    %cst_57 = arith.constant 1.000000e+00 : f32
    %246 = vector.broadcast %cst_57 : f32 to vector<2x32xf32>
    %247 = arith.addf %246, %245 : vector<2x32xf32>
    %248 = arith.divf %246, %247 : vector<2x32xf32>
    %249 = vector.extract_strided_slice %240 {offsets = [0, 32], sizes = [2, 32], strides = [1, 1]} : vector<2x96xf32> to vector<2x32xf32>
    %250 = vector.extract_strided_slice %237 {offsets = [0, 32], sizes = [2, 32], strides = [1, 1]} : vector<2x96xf32> to vector<2x32xf32>
    %251 = arith.addf %249, %250 : vector<2x32xf32>
    %252 = arith.negf %251 : vector<2x32xf32>
    %253 = math.exp %252 : vector<2x32xf32>
    %cst_58 = arith.constant 1.000000e+00 : f32
    %254 = vector.broadcast %cst_58 : f32 to vector<2x32xf32>
    %255 = arith.addf %254, %253 : vector<2x32xf32>
    %256 = arith.divf %254, %255 : vector<2x32xf32>
    %257 = vector.extract_strided_slice %240 {offsets = [0, 64], sizes = [2, 32], strides = [1, 1]} : vector<2x96xf32> to vector<2x32xf32>
    %258 = vector.extract_strided_slice %237 {offsets = [0, 64], sizes = [2, 32], strides = [1, 1]} : vector<2x96xf32> to vector<2x32xf32>
    %259 = arith.mulf %248, %258 : vector<2x32xf32>
    %260 = arith.addf %257, %259 : vector<2x32xf32>
    %261 = math.tanh %260 : vector<2x32xf32>
    %cst_59 = arith.constant 1.000000e+00 : f32
    %262 = vector.broadcast %cst_59 : f32 to vector<2x32xf32>
    %263 = arith.subf %262, %256 : vector<2x32xf32>
    %264 = arith.mulf %263, %261 : vector<2x32xf32>
    %265 = arith.mulf %256, %228 : vector<2x32xf32>
    %266 = arith.addf %264, %265 : vector<2x32xf32>
    %267 = arith.truncf %266 : vector<2x32xf32> to vector<2x32xbf16>
    %268 = arith.index_cast %c6_i32 : i32 to index
    %c0_60 = arith.constant 0 : index
    %c0_61 = arith.constant 0 : index
    %269 = vector.load %arg6[%268, %c0_60, %c0_61] : memref<8x2x32xbf16, #tpu.memory_space<vmem>>, vector<1x2x32xbf16>
    %270 = vector.shape_cast %269 : vector<1x2x32xbf16> to vector<2x32xbf16>
    %271 = vector.shape_cast %267 : vector<2x32xbf16> to vector<1x2x32xbf16>
    tpu.vector_store %arg6[%268, %c0_60, %c0_61], %271 {strides = array<i32>} : memref<8x2x32xbf16, #tpu.memory_space<vmem>>, vector<1x2x32xbf16>,
    %c7_i32 = arith.constant 7 : i32
    %272 = arith.truncf %266 : vector<2x32xf32> to vector<2x32xbf16>
    %cst_62 = arith.constant dense<0.000000e+00> : vector<2x96xf32>
    %273 = tpu.matmul %272, %3, %cst_62 {dimension_numbers = #tpu.dot_dimension_numbers<[1], [0], [0], [1], [0, 0, 1, 1], [], []>} : vector<2x32xbf16>, vector<32x96xbf16>, vector<2x96xf32> -> vector<2x96xf32>
    %274 = vector.broadcast %4 : vector<1x96xf32> to vector<2x96xf32>
    %275 = arith.addf %273, %274 : vector<2x96xf32>
    %276 = arith.index_cast %c7_i32 : i32 to index
    %c0_63 = arith.constant 0 : index
    %c0_64 = arith.constant 0 : index
    %277 = vector.load %arg2[%276, %c0_63, %c0_64] : memref<8x2x96xf32, #tpu.memory_space<vmem>>, vector<1x2x96xf32>
    %278 = vector.shape_cast %277 : vector<1x2x96xf32> to vector<2x96xf32>
    %279 = vector.extract_strided_slice %278 {offsets = [0, 0], sizes = [2, 32], strides = [1, 1]} : vector<2x96xf32> to vector<2x32xf32>
    %280 = vector.extract_strided_slice %275 {offsets = [0, 0], sizes = [2, 32], strides = [1, 1]} : vector<2x96xf32> to vector<2x32xf32>
    %281 = arith.addf %279, %280 : vector<2x32xf32>
    %282 = arith.negf %281 : vector<2x32xf32>
    %283 = math.exp %282 : vector<2x32xf32>
    %cst_65 = arith.constant 1.000000e+00 : f32
    %284 = vector.broadcast %cst_65 : f32 to vector<2x32xf32>
    %285 = arith.addf %284, %283 : vector<2x32xf32>
    %286 = arith.divf %284, %285 : vector<2x32xf32>
    %287 = vector.extract_strided_slice %278 {offsets = [0, 32], sizes = [2, 32], strides = [1, 1]} : vector<2x96xf32> to vector<2x32xf32>
    %288 = vector.extract_strided_slice %275 {offsets = [0, 32], sizes = [2, 32], strides = [1, 1]} : vector<2x96xf32> to vector<2x32xf32>
    %289 = arith.addf %287, %288 : vector<2x32xf32>
    %290 = arith.negf %289 : vector<2x32xf32>
    %291 = math.exp %290 : vector<2x32xf32>
    %cst_66 = arith.constant 1.000000e+00 : f32
    %292 = vector.broadcast %cst_66 : f32 to vector<2x32xf32>
    %293 = arith.addf %292, %291 : vector<2x32xf32>
    %294 = arith.divf %292, %293 : vector<2x32xf32>
    %295 = vector.extract_strided_slice %278 {offsets = [0, 64], sizes = [2, 32], strides = [1, 1]} : vector<2x96xf32> to vector<2x32xf32>
    %296 = vector.extract_strided_slice %275 {offsets = [0, 64], sizes = [2, 32], strides = [1, 1]} : vector<2x96xf32> to vector<2x32xf32>
    %297 = arith.mulf %286, %296 : vector<2x32xf32>
    %298 = arith.addf %295, %297 : vector<2x32xf32>
    %299 = math.tanh %298 : vector<2x32xf32>
    %cst_67 = arith.constant 1.000000e+00 : f32
    %300 = vector.broadcast %cst_67 : f32 to vector<2x32xf32>
    %301 = arith.subf %300, %294 : vector<2x32xf32>
    %302 = arith.mulf %301, %299 : vector<2x32xf32>
    %303 = arith.mulf %294, %266 : vector<2x32xf32>
    %304 = arith.addf %302, %303 : vector<2x32xf32>
    %305 = arith.truncf %304 : vector<2x32xf32> to vector<2x32xbf16>
    %306 = arith.index_cast %c7_i32 : i32 to index
    %c0_68 = arith.constant 0 : index
    %c0_69 = arith.constant 0 : index
    %307 = vector.load %arg6[%306, %c0_68, %c0_69] : memref<8x2x32xbf16, #tpu.memory_space<vmem>>, vector<1x2x32xbf16>
    %308 = vector.shape_cast %307 : vector<1x2x32xbf16> to vector<2x32xbf16>
    %309 = vector.shape_cast %305 : vector<2x32xbf16> to vector<1x2x32xbf16>
    tpu.vector_store %arg6[%306, %c0_68, %c0_69], %309 {strides = array<i32>} : memref<8x2x32xbf16, #tpu.memory_space<vmem>>, vector<1x2x32xbf16>,
    %c8_i32 = arith.constant 8 : i32
    %c0_70 = arith.constant 0 : index
    %c0_71 = arith.constant 0 : index
    %310 = vector.load %arg8[%c0_70, %c0_71] : memref<2x32xf32, #tpu.memory_space<vmem>>, vector<2x32xf32>
    tpu.vector_store %arg8[%c0_70, %c0_71], %304 {strides = array<i32>} : memref<2x32xf32, #tpu.memory_space<vmem>>, vector<2x32xf32>,
    %c0_i32_72 = arith.constant 0 : i32
    %311 = arith.cmpi eq, %arg1, %c0_i32_72 : i32
    %312 = arith.extui %311 : i1 to i32
    %c0_i32_73 = arith.constant 0 : i32
    %313 = arith.cmpi ne, %312, %c0_i32_73 : i32
    scf.if %313 {
      %c0_74 = arith.constant 0 : index
      %c0_75 = arith.constant 0 : index
      %314 = vector.load %arg7[%c0_74, %c0_75] : memref<2x32xf32, #tpu.memory_space<vmem>>, vector<2x32xf32>
      tpu.vector_store %arg7[%c0_74, %c0_75], %304 {strides = array<i32>} : memref<2x32xf32, #tpu.memory_space<vmem>>, vector<2x32xf32>,
    } else {
    }
    return
  }
  func.func @transform_0(%arg0: i32, %arg1: i32) -> (i32, i32, i32) {
    %c0_i32 = arith.constant 0 : i32
    %c0_i32_0 = arith.constant 0 : i32
    return %arg1, %arg0, %c0_i32 : i32, i32, i32
  }
  func.func @transform_1(%arg0: i32, %arg1: i32) -> (i32, i32) {
    %c0_i32 = arith.constant 0 : i32
    %c0_i32_0 = arith.constant 0 : i32
    return %arg0, %c0_i32 : i32, i32
  }
  func.func @transform_2(%arg0: i32, %arg1: i32) -> (i32, i32) {
    %c0_i32 = arith.constant 0 : i32
    %c0_i32_0 = arith.constant 0 : i32
    %c0_i32_1 = arith.constant 0 : i32
    return %c0_i32, %c0_i32_0 : i32, i32
  }
  func.func @transform_3(%arg0: i32, %arg1: i32) -> (i32, i32) {
    %c0_i32 = arith.constant 0 : i32
    %c0_i32_0 = arith.constant 0 : i32
    %c0_i32_1 = arith.constant 0 : i32
    return %c0_i32, %c0_i32_0 : i32, i32
  }
  func.func @transform_4(%arg0: i32, %arg1: i32) -> (i32, i32, i32) {
    %c0_i32 = arith.constant 0 : i32
    %c0_i32_0 = arith.constant 0 : i32
    return %arg1, %arg0, %c0_i32 : i32, i32, i32
  }
  func.func @transform_5(%arg0: i32, %arg1: i32) -> (i32, i32) {
    %c0_i32 = arith.constant 0 : i32
    %c0_i32_0 = arith.constant 0 : i32
    return %arg0, %c0_i32 : i32, i32
  }
}

module attributes {stable_mosaic.version = 11 : i64} {
  func.func @_gru_rec_fc_kernel(%arg0: i32, %arg1: i32, %arg2: memref<8x2x96xf32, #tpu.memory_space<vmem>>, %arg3: memref<2x32xf32, #tpu.memory_space<vmem>>, %arg4: memref<32x96xbf16, #tpu.memory_space<vmem>>, %arg5: memref<1x96xf32, #tpu.memory_space<vmem>>, %arg6: memref<32x10xf32, #tpu.memory_space<vmem>>, %arg7: memref<1x10xf32, #tpu.memory_space<vmem>>, %arg8: memref<2x32xf32, #tpu.memory_space<vmem>>, %arg9: memref<2x10xf32, #tpu.memory_space<vmem>>, %arg10: memref<2x32xf32, #tpu.memory_space<vmem>>) attributes {dimension_semantics = [#tpu.dimension_semantics<parallel>, #tpu.dimension_semantics<arbitrary>], iteration_bounds = array<i64: 1, 1>, scalar_prefetch = 0 : i64, scratch_operands = 1 : i64, tpu.core_type = #tpu.core_type<tc>, window_params = [{transform_indices = @transform_0, window_bounds = array<i64: 8, 2, 96>}, {transform_indices = @transform_1, window_bounds = array<i64: 2, 32>}, {pipeline_mode = #tpu.pipeline_mode<synchronous>, transform_indices = @transform_2, window_bounds = array<i64: 32, 96>}, {pipeline_mode = #tpu.pipeline_mode<synchronous>, transform_indices = @transform_3, window_bounds = array<i64: 1, 96>}, {pipeline_mode = #tpu.pipeline_mode<synchronous>, transform_indices = @transform_4, window_bounds = array<i64: 32, 10>}, {pipeline_mode = #tpu.pipeline_mode<synchronous>, transform_indices = @transform_5, window_bounds = array<i64: 1, 10>}, {transform_indices = @transform_6, window_bounds = array<i64: 2, 32>}, {transform_indices = @transform_7, window_bounds = array<i64: 2, 10>}]} {
    %c0_i32 = arith.constant 0 : i32
    %0 = arith.cmpi eq, %arg1, %c0_i32 : i32
    %1 = arith.extui %0 : i1 to i32
    %c0_i32_0 = arith.constant 0 : i32
    %2 = arith.cmpi ne, %1, %c0_i32_0 : i32
    scf.if %2 {
      %c0_58 = arith.constant 0 : index
      %c0_59 = arith.constant 0 : index
      %274 = vector.load %arg3[%c0_58, %c0_59] : memref<2x32xf32, #tpu.memory_space<vmem>>, vector<2x32xf32>
      %c0_60 = arith.constant 0 : index
      %c0_61 = arith.constant 0 : index
      %275 = vector.load %arg10[%c0_60, %c0_61] : memref<2x32xf32, #tpu.memory_space<vmem>>, vector<2x32xf32>
      tpu.vector_store %arg10[%c0_60, %c0_61], %274 {strides = array<i32>} : memref<2x32xf32, #tpu.memory_space<vmem>>, vector<2x32xf32>,
    } else {
    }
    %c0 = arith.constant 0 : index
    %c0_1 = arith.constant 0 : index
    %3 = vector.load %arg4[%c0, %c0_1] : memref<32x96xbf16, #tpu.memory_space<vmem>>, vector<32x96xbf16>
    %c0_2 = arith.constant 0 : index
    %c0_3 = arith.constant 0 : index
    %4 = vector.load %arg5[%c0_2, %c0_3] : memref<1x96xf32, #tpu.memory_space<vmem>>, vector<1x96xf32>
    %c0_4 = arith.constant 0 : index
    %c0_5 = arith.constant 0 : index
    %5 = vector.load %arg10[%c0_4, %c0_5] : memref<2x32xf32, #tpu.memory_space<vmem>>, vector<2x32xf32>
    %c0_i32_6 = arith.constant 0 : i32
    %6 = arith.truncf %5 : vector<2x32xf32> to vector<2x32xbf16>
    %cst = arith.constant dense<0.000000e+00> : vector<2x96xf32>
    %7 = tpu.matmul %6, %3, %cst {dimension_numbers = #tpu.dot_dimension_numbers<[1], [0], [0], [1], [0, 0, 1, 1], [], []>} : vector<2x32xbf16>, vector<32x96xbf16>, vector<2x96xf32> -> vector<2x96xf32>
    %8 = vector.broadcast %4 : vector<1x96xf32> to vector<2x96xf32>
    %9 = arith.addf %7, %8 : vector<2x96xf32>
    %10 = arith.index_cast %c0_i32_6 : i32 to index
    %c0_7 = arith.constant 0 : index
    %c0_8 = arith.constant 0 : index
    %11 = vector.load %arg2[%10, %c0_7, %c0_8] : memref<8x2x96xf32, #tpu.memory_space<vmem>>, vector<1x2x96xf32>
    %12 = vector.shape_cast %11 : vector<1x2x96xf32> to vector<2x96xf32>
    %13 = vector.extract_strided_slice %12 {offsets = [0, 0], sizes = [2, 32], strides = [1, 1]} : vector<2x96xf32> to vector<2x32xf32>
    %14 = vector.extract_strided_slice %9 {offsets = [0, 0], sizes = [2, 32], strides = [1, 1]} : vector<2x96xf32> to vector<2x32xf32>
    %15 = arith.addf %13, %14 : vector<2x32xf32>
    %16 = arith.negf %15 : vector<2x32xf32>
    %17 = math.exp %16 : vector<2x32xf32>
    %cst_9 = arith.constant 1.000000e+00 : f32
    %18 = vector.broadcast %cst_9 : f32 to vector<2x32xf32>
    %19 = arith.addf %18, %17 : vector<2x32xf32>
    %20 = arith.divf %18, %19 : vector<2x32xf32>
    %21 = vector.extract_strided_slice %12 {offsets = [0, 32], sizes = [2, 32], strides = [1, 1]} : vector<2x96xf32> to vector<2x32xf32>
    %22 = vector.extract_strided_slice %9 {offsets = [0, 32], sizes = [2, 32], strides = [1, 1]} : vector<2x96xf32> to vector<2x32xf32>
    %23 = arith.addf %21, %22 : vector<2x32xf32>
    %24 = arith.negf %23 : vector<2x32xf32>
    %25 = math.exp %24 : vector<2x32xf32>
    %cst_10 = arith.constant 1.000000e+00 : f32
    %26 = vector.broadcast %cst_10 : f32 to vector<2x32xf32>
    %27 = arith.addf %26, %25 : vector<2x32xf32>
    %28 = arith.divf %26, %27 : vector<2x32xf32>
    %29 = vector.extract_strided_slice %12 {offsets = [0, 64], sizes = [2, 32], strides = [1, 1]} : vector<2x96xf32> to vector<2x32xf32>
    %30 = vector.extract_strided_slice %9 {offsets = [0, 64], sizes = [2, 32], strides = [1, 1]} : vector<2x96xf32> to vector<2x32xf32>
    %31 = arith.mulf %20, %30 : vector<2x32xf32>
    %32 = arith.addf %29, %31 : vector<2x32xf32>
    %33 = math.tanh %32 : vector<2x32xf32>
    %cst_11 = arith.constant 1.000000e+00 : f32
    %34 = vector.broadcast %cst_11 : f32 to vector<2x32xf32>
    %35 = arith.subf %34, %28 : vector<2x32xf32>
    %36 = arith.mulf %35, %33 : vector<2x32xf32>
    %37 = arith.mulf %28, %5 : vector<2x32xf32>
    %38 = arith.addf %36, %37 : vector<2x32xf32>
    %c1_i32 = arith.constant 1 : i32
    %39 = arith.truncf %38 : vector<2x32xf32> to vector<2x32xbf16>
    %cst_12 = arith.constant dense<0.000000e+00> : vector<2x96xf32>
    %40 = tpu.matmul %39, %3, %cst_12 {dimension_numbers = #tpu.dot_dimension_numbers<[1], [0], [0], [1], [0, 0, 1, 1], [], []>} : vector<2x32xbf16>, vector<32x96xbf16>, vector<2x96xf32> -> vector<2x96xf32>
    %41 = vector.broadcast %4 : vector<1x96xf32> to vector<2x96xf32>
    %42 = arith.addf %40, %41 : vector<2x96xf32>
    %43 = arith.index_cast %c1_i32 : i32 to index
    %c0_13 = arith.constant 0 : index
    %c0_14 = arith.constant 0 : index
    %44 = vector.load %arg2[%43, %c0_13, %c0_14] : memref<8x2x96xf32, #tpu.memory_space<vmem>>, vector<1x2x96xf32>
    %45 = vector.shape_cast %44 : vector<1x2x96xf32> to vector<2x96xf32>
    %46 = vector.extract_strided_slice %45 {offsets = [0, 0], sizes = [2, 32], strides = [1, 1]} : vector<2x96xf32> to vector<2x32xf32>
    %47 = vector.extract_strided_slice %42 {offsets = [0, 0], sizes = [2, 32], strides = [1, 1]} : vector<2x96xf32> to vector<2x32xf32>
    %48 = arith.addf %46, %47 : vector<2x32xf32>
    %49 = arith.negf %48 : vector<2x32xf32>
    %50 = math.exp %49 : vector<2x32xf32>
    %cst_15 = arith.constant 1.000000e+00 : f32
    %51 = vector.broadcast %cst_15 : f32 to vector<2x32xf32>
    %52 = arith.addf %51, %50 : vector<2x32xf32>
    %53 = arith.divf %51, %52 : vector<2x32xf32>
    %54 = vector.extract_strided_slice %45 {offsets = [0, 32], sizes = [2, 32], strides = [1, 1]} : vector<2x96xf32> to vector<2x32xf32>
    %55 = vector.extract_strided_slice %42 {offsets = [0, 32], sizes = [2, 32], strides = [1, 1]} : vector<2x96xf32> to vector<2x32xf32>
    %56 = arith.addf %54, %55 : vector<2x32xf32>
    %57 = arith.negf %56 : vector<2x32xf32>
    %58 = math.exp %57 : vector<2x32xf32>
    %cst_16 = arith.constant 1.000000e+00 : f32
    %59 = vector.broadcast %cst_16 : f32 to vector<2x32xf32>
    %60 = arith.addf %59, %58 : vector<2x32xf32>
    %61 = arith.divf %59, %60 : vector<2x32xf32>
    %62 = vector.extract_strided_slice %45 {offsets = [0, 64], sizes = [2, 32], strides = [1, 1]} : vector<2x96xf32> to vector<2x32xf32>
    %63 = vector.extract_strided_slice %42 {offsets = [0, 64], sizes = [2, 32], strides = [1, 1]} : vector<2x96xf32> to vector<2x32xf32>
    %64 = arith.mulf %53, %63 : vector<2x32xf32>
    %65 = arith.addf %62, %64 : vector<2x32xf32>
    %66 = math.tanh %65 : vector<2x32xf32>
    %cst_17 = arith.constant 1.000000e+00 : f32
    %67 = vector.broadcast %cst_17 : f32 to vector<2x32xf32>
    %68 = arith.subf %67, %61 : vector<2x32xf32>
    %69 = arith.mulf %68, %66 : vector<2x32xf32>
    %70 = arith.mulf %61, %38 : vector<2x32xf32>
    %71 = arith.addf %69, %70 : vector<2x32xf32>
    %c2_i32 = arith.constant 2 : i32
    %72 = arith.truncf %71 : vector<2x32xf32> to vector<2x32xbf16>
    %cst_18 = arith.constant dense<0.000000e+00> : vector<2x96xf32>
    %73 = tpu.matmul %72, %3, %cst_18 {dimension_numbers = #tpu.dot_dimension_numbers<[1], [0], [0], [1], [0, 0, 1, 1], [], []>} : vector<2x32xbf16>, vector<32x96xbf16>, vector<2x96xf32> -> vector<2x96xf32>
    %74 = vector.broadcast %4 : vector<1x96xf32> to vector<2x96xf32>
    %75 = arith.addf %73, %74 : vector<2x96xf32>
    %76 = arith.index_cast %c2_i32 : i32 to index
    %c0_19 = arith.constant 0 : index
    %c0_20 = arith.constant 0 : index
    %77 = vector.load %arg2[%76, %c0_19, %c0_20] : memref<8x2x96xf32, #tpu.memory_space<vmem>>, vector<1x2x96xf32>
    %78 = vector.shape_cast %77 : vector<1x2x96xf32> to vector<2x96xf32>
    %79 = vector.extract_strided_slice %78 {offsets = [0, 0], sizes = [2, 32], strides = [1, 1]} : vector<2x96xf32> to vector<2x32xf32>
    %80 = vector.extract_strided_slice %75 {offsets = [0, 0], sizes = [2, 32], strides = [1, 1]} : vector<2x96xf32> to vector<2x32xf32>
    %81 = arith.addf %79, %80 : vector<2x32xf32>
    %82 = arith.negf %81 : vector<2x32xf32>
    %83 = math.exp %82 : vector<2x32xf32>
    %cst_21 = arith.constant 1.000000e+00 : f32
    %84 = vector.broadcast %cst_21 : f32 to vector<2x32xf32>
    %85 = arith.addf %84, %83 : vector<2x32xf32>
    %86 = arith.divf %84, %85 : vector<2x32xf32>
    %87 = vector.extract_strided_slice %78 {offsets = [0, 32], sizes = [2, 32], strides = [1, 1]} : vector<2x96xf32> to vector<2x32xf32>
    %88 = vector.extract_strided_slice %75 {offsets = [0, 32], sizes = [2, 32], strides = [1, 1]} : vector<2x96xf32> to vector<2x32xf32>
    %89 = arith.addf %87, %88 : vector<2x32xf32>
    %90 = arith.negf %89 : vector<2x32xf32>
    %91 = math.exp %90 : vector<2x32xf32>
    %cst_22 = arith.constant 1.000000e+00 : f32
    %92 = vector.broadcast %cst_22 : f32 to vector<2x32xf32>
    %93 = arith.addf %92, %91 : vector<2x32xf32>
    %94 = arith.divf %92, %93 : vector<2x32xf32>
    %95 = vector.extract_strided_slice %78 {offsets = [0, 64], sizes = [2, 32], strides = [1, 1]} : vector<2x96xf32> to vector<2x32xf32>
    %96 = vector.extract_strided_slice %75 {offsets = [0, 64], sizes = [2, 32], strides = [1, 1]} : vector<2x96xf32> to vector<2x32xf32>
    %97 = arith.mulf %86, %96 : vector<2x32xf32>
    %98 = arith.addf %95, %97 : vector<2x32xf32>
    %99 = math.tanh %98 : vector<2x32xf32>
    %cst_23 = arith.constant 1.000000e+00 : f32
    %100 = vector.broadcast %cst_23 : f32 to vector<2x32xf32>
    %101 = arith.subf %100, %94 : vector<2x32xf32>
    %102 = arith.mulf %101, %99 : vector<2x32xf32>
    %103 = arith.mulf %94, %71 : vector<2x32xf32>
    %104 = arith.addf %102, %103 : vector<2x32xf32>
    %c3_i32 = arith.constant 3 : i32
    %105 = arith.truncf %104 : vector<2x32xf32> to vector<2x32xbf16>
    %cst_24 = arith.constant dense<0.000000e+00> : vector<2x96xf32>
    %106 = tpu.matmul %105, %3, %cst_24 {dimension_numbers = #tpu.dot_dimension_numbers<[1], [0], [0], [1], [0, 0, 1, 1], [], []>} : vector<2x32xbf16>, vector<32x96xbf16>, vector<2x96xf32> -> vector<2x96xf32>
    %107 = vector.broadcast %4 : vector<1x96xf32> to vector<2x96xf32>
    %108 = arith.addf %106, %107 : vector<2x96xf32>
    %109 = arith.index_cast %c3_i32 : i32 to index
    %c0_25 = arith.constant 0 : index
    %c0_26 = arith.constant 0 : index
    %110 = vector.load %arg2[%109, %c0_25, %c0_26] : memref<8x2x96xf32, #tpu.memory_space<vmem>>, vector<1x2x96xf32>
    %111 = vector.shape_cast %110 : vector<1x2x96xf32> to vector<2x96xf32>
    %112 = vector.extract_strided_slice %111 {offsets = [0, 0], sizes = [2, 32], strides = [1, 1]} : vector<2x96xf32> to vector<2x32xf32>
    %113 = vector.extract_strided_slice %108 {offsets = [0, 0], sizes = [2, 32], strides = [1, 1]} : vector<2x96xf32> to vector<2x32xf32>
    %114 = arith.addf %112, %113 : vector<2x32xf32>
    %115 = arith.negf %114 : vector<2x32xf32>
    %116 = math.exp %115 : vector<2x32xf32>
    %cst_27 = arith.constant 1.000000e+00 : f32
    %117 = vector.broadcast %cst_27 : f32 to vector<2x32xf32>
    %118 = arith.addf %117, %116 : vector<2x32xf32>
    %119 = arith.divf %117, %118 : vector<2x32xf32>
    %120 = vector.extract_strided_slice %111 {offsets = [0, 32], sizes = [2, 32], strides = [1, 1]} : vector<2x96xf32> to vector<2x32xf32>
    %121 = vector.extract_strided_slice %108 {offsets = [0, 32], sizes = [2, 32], strides = [1, 1]} : vector<2x96xf32> to vector<2x32xf32>
    %122 = arith.addf %120, %121 : vector<2x32xf32>
    %123 = arith.negf %122 : vector<2x32xf32>
    %124 = math.exp %123 : vector<2x32xf32>
    %cst_28 = arith.constant 1.000000e+00 : f32
    %125 = vector.broadcast %cst_28 : f32 to vector<2x32xf32>
    %126 = arith.addf %125, %124 : vector<2x32xf32>
    %127 = arith.divf %125, %126 : vector<2x32xf32>
    %128 = vector.extract_strided_slice %111 {offsets = [0, 64], sizes = [2, 32], strides = [1, 1]} : vector<2x96xf32> to vector<2x32xf32>
    %129 = vector.extract_strided_slice %108 {offsets = [0, 64], sizes = [2, 32], strides = [1, 1]} : vector<2x96xf32> to vector<2x32xf32>
    %130 = arith.mulf %119, %129 : vector<2x32xf32>
    %131 = arith.addf %128, %130 : vector<2x32xf32>
    %132 = math.tanh %131 : vector<2x32xf32>
    %cst_29 = arith.constant 1.000000e+00 : f32
    %133 = vector.broadcast %cst_29 : f32 to vector<2x32xf32>
    %134 = arith.subf %133, %127 : vector<2x32xf32>
    %135 = arith.mulf %134, %132 : vector<2x32xf32>
    %136 = arith.mulf %127, %104 : vector<2x32xf32>
    %137 = arith.addf %135, %136 : vector<2x32xf32>
    %c4_i32 = arith.constant 4 : i32
    %138 = arith.truncf %137 : vector<2x32xf32> to vector<2x32xbf16>
    %cst_30 = arith.constant dense<0.000000e+00> : vector<2x96xf32>
    %139 = tpu.matmul %138, %3, %cst_30 {dimension_numbers = #tpu.dot_dimension_numbers<[1], [0], [0], [1], [0, 0, 1, 1], [], []>} : vector<2x32xbf16>, vector<32x96xbf16>, vector<2x96xf32> -> vector<2x96xf32>
    %140 = vector.broadcast %4 : vector<1x96xf32> to vector<2x96xf32>
    %141 = arith.addf %139, %140 : vector<2x96xf32>
    %142 = arith.index_cast %c4_i32 : i32 to index
    %c0_31 = arith.constant 0 : index
    %c0_32 = arith.constant 0 : index
    %143 = vector.load %arg2[%142, %c0_31, %c0_32] : memref<8x2x96xf32, #tpu.memory_space<vmem>>, vector<1x2x96xf32>
    %144 = vector.shape_cast %143 : vector<1x2x96xf32> to vector<2x96xf32>
    %145 = vector.extract_strided_slice %144 {offsets = [0, 0], sizes = [2, 32], strides = [1, 1]} : vector<2x96xf32> to vector<2x32xf32>
    %146 = vector.extract_strided_slice %141 {offsets = [0, 0], sizes = [2, 32], strides = [1, 1]} : vector<2x96xf32> to vector<2x32xf32>
    %147 = arith.addf %145, %146 : vector<2x32xf32>
    %148 = arith.negf %147 : vector<2x32xf32>
    %149 = math.exp %148 : vector<2x32xf32>
    %cst_33 = arith.constant 1.000000e+00 : f32
    %150 = vector.broadcast %cst_33 : f32 to vector<2x32xf32>
    %151 = arith.addf %150, %149 : vector<2x32xf32>
    %152 = arith.divf %150, %151 : vector<2x32xf32>
    %153 = vector.extract_strided_slice %144 {offsets = [0, 32], sizes = [2, 32], strides = [1, 1]} : vector<2x96xf32> to vector<2x32xf32>
    %154 = vector.extract_strided_slice %141 {offsets = [0, 32], sizes = [2, 32], strides = [1, 1]} : vector<2x96xf32> to vector<2x32xf32>
    %155 = arith.addf %153, %154 : vector<2x32xf32>
    %156 = arith.negf %155 : vector<2x32xf32>
    %157 = math.exp %156 : vector<2x32xf32>
    %cst_34 = arith.constant 1.000000e+00 : f32
    %158 = vector.broadcast %cst_34 : f32 to vector<2x32xf32>
    %159 = arith.addf %158, %157 : vector<2x32xf32>
    %160 = arith.divf %158, %159 : vector<2x32xf32>
    %161 = vector.extract_strided_slice %144 {offsets = [0, 64], sizes = [2, 32], strides = [1, 1]} : vector<2x96xf32> to vector<2x32xf32>
    %162 = vector.extract_strided_slice %141 {offsets = [0, 64], sizes = [2, 32], strides = [1, 1]} : vector<2x96xf32> to vector<2x32xf32>
    %163 = arith.mulf %152, %162 : vector<2x32xf32>
    %164 = arith.addf %161, %163 : vector<2x32xf32>
    %165 = math.tanh %164 : vector<2x32xf32>
    %cst_35 = arith.constant 1.000000e+00 : f32
    %166 = vector.broadcast %cst_35 : f32 to vector<2x32xf32>
    %167 = arith.subf %166, %160 : vector<2x32xf32>
    %168 = arith.mulf %167, %165 : vector<2x32xf32>
    %169 = arith.mulf %160, %137 : vector<2x32xf32>
    %170 = arith.addf %168, %169 : vector<2x32xf32>
    %c5_i32 = arith.constant 5 : i32
    %171 = arith.truncf %170 : vector<2x32xf32> to vector<2x32xbf16>
    %cst_36 = arith.constant dense<0.000000e+00> : vector<2x96xf32>
    %172 = tpu.matmul %171, %3, %cst_36 {dimension_numbers = #tpu.dot_dimension_numbers<[1], [0], [0], [1], [0, 0, 1, 1], [], []>} : vector<2x32xbf16>, vector<32x96xbf16>, vector<2x96xf32> -> vector<2x96xf32>
    %173 = vector.broadcast %4 : vector<1x96xf32> to vector<2x96xf32>
    %174 = arith.addf %172, %173 : vector<2x96xf32>
    %175 = arith.index_cast %c5_i32 : i32 to index
    %c0_37 = arith.constant 0 : index
    %c0_38 = arith.constant 0 : index
    %176 = vector.load %arg2[%175, %c0_37, %c0_38] : memref<8x2x96xf32, #tpu.memory_space<vmem>>, vector<1x2x96xf32>
    %177 = vector.shape_cast %176 : vector<1x2x96xf32> to vector<2x96xf32>
    %178 = vector.extract_strided_slice %177 {offsets = [0, 0], sizes = [2, 32], strides = [1, 1]} : vector<2x96xf32> to vector<2x32xf32>
    %179 = vector.extract_strided_slice %174 {offsets = [0, 0], sizes = [2, 32], strides = [1, 1]} : vector<2x96xf32> to vector<2x32xf32>
    %180 = arith.addf %178, %179 : vector<2x32xf32>
    %181 = arith.negf %180 : vector<2x32xf32>
    %182 = math.exp %181 : vector<2x32xf32>
    %cst_39 = arith.constant 1.000000e+00 : f32
    %183 = vector.broadcast %cst_39 : f32 to vector<2x32xf32>
    %184 = arith.addf %183, %182 : vector<2x32xf32>
    %185 = arith.divf %183, %184 : vector<2x32xf32>
    %186 = vector.extract_strided_slice %177 {offsets = [0, 32], sizes = [2, 32], strides = [1, 1]} : vector<2x96xf32> to vector<2x32xf32>
    %187 = vector.extract_strided_slice %174 {offsets = [0, 32], sizes = [2, 32], strides = [1, 1]} : vector<2x96xf32> to vector<2x32xf32>
    %188 = arith.addf %186, %187 : vector<2x32xf32>
    %189 = arith.negf %188 : vector<2x32xf32>
    %190 = math.exp %189 : vector<2x32xf32>
    %cst_40 = arith.constant 1.000000e+00 : f32
    %191 = vector.broadcast %cst_40 : f32 to vector<2x32xf32>
    %192 = arith.addf %191, %190 : vector<2x32xf32>
    %193 = arith.divf %191, %192 : vector<2x32xf32>
    %194 = vector.extract_strided_slice %177 {offsets = [0, 64], sizes = [2, 32], strides = [1, 1]} : vector<2x96xf32> to vector<2x32xf32>
    %195 = vector.extract_strided_slice %174 {offsets = [0, 64], sizes = [2, 32], strides = [1, 1]} : vector<2x96xf32> to vector<2x32xf32>
    %196 = arith.mulf %185, %195 : vector<2x32xf32>
    %197 = arith.addf %194, %196 : vector<2x32xf32>
    %198 = math.tanh %197 : vector<2x32xf32>
    %cst_41 = arith.constant 1.000000e+00 : f32
    %199 = vector.broadcast %cst_41 : f32 to vector<2x32xf32>
    %200 = arith.subf %199, %193 : vector<2x32xf32>
    %201 = arith.mulf %200, %198 : vector<2x32xf32>
    %202 = arith.mulf %193, %170 : vector<2x32xf32>
    %203 = arith.addf %201, %202 : vector<2x32xf32>
    %c6_i32 = arith.constant 6 : i32
    %204 = arith.truncf %203 : vector<2x32xf32> to vector<2x32xbf16>
    %cst_42 = arith.constant dense<0.000000e+00> : vector<2x96xf32>
    %205 = tpu.matmul %204, %3, %cst_42 {dimension_numbers = #tpu.dot_dimension_numbers<[1], [0], [0], [1], [0, 0, 1, 1], [], []>} : vector<2x32xbf16>, vector<32x96xbf16>, vector<2x96xf32> -> vector<2x96xf32>
    %206 = vector.broadcast %4 : vector<1x96xf32> to vector<2x96xf32>
    %207 = arith.addf %205, %206 : vector<2x96xf32>
    %208 = arith.index_cast %c6_i32 : i32 to index
    %c0_43 = arith.constant 0 : index
    %c0_44 = arith.constant 0 : index
    %209 = vector.load %arg2[%208, %c0_43, %c0_44] : memref<8x2x96xf32, #tpu.memory_space<vmem>>, vector<1x2x96xf32>
    %210 = vector.shape_cast %209 : vector<1x2x96xf32> to vector<2x96xf32>
    %211 = vector.extract_strided_slice %210 {offsets = [0, 0], sizes = [2, 32], strides = [1, 1]} : vector<2x96xf32> to vector<2x32xf32>
    %212 = vector.extract_strided_slice %207 {offsets = [0, 0], sizes = [2, 32], strides = [1, 1]} : vector<2x96xf32> to vector<2x32xf32>
    %213 = arith.addf %211, %212 : vector<2x32xf32>
    %214 = arith.negf %213 : vector<2x32xf32>
    %215 = math.exp %214 : vector<2x32xf32>
    %cst_45 = arith.constant 1.000000e+00 : f32
    %216 = vector.broadcast %cst_45 : f32 to vector<2x32xf32>
    %217 = arith.addf %216, %215 : vector<2x32xf32>
    %218 = arith.divf %216, %217 : vector<2x32xf32>
    %219 = vector.extract_strided_slice %210 {offsets = [0, 32], sizes = [2, 32], strides = [1, 1]} : vector<2x96xf32> to vector<2x32xf32>
    %220 = vector.extract_strided_slice %207 {offsets = [0, 32], sizes = [2, 32], strides = [1, 1]} : vector<2x96xf32> to vector<2x32xf32>
    %221 = arith.addf %219, %220 : vector<2x32xf32>
    %222 = arith.negf %221 : vector<2x32xf32>
    %223 = math.exp %222 : vector<2x32xf32>
    %cst_46 = arith.constant 1.000000e+00 : f32
    %224 = vector.broadcast %cst_46 : f32 to vector<2x32xf32>
    %225 = arith.addf %224, %223 : vector<2x32xf32>
    %226 = arith.divf %224, %225 : vector<2x32xf32>
    %227 = vector.extract_strided_slice %210 {offsets = [0, 64], sizes = [2, 32], strides = [1, 1]} : vector<2x96xf32> to vector<2x32xf32>
    %228 = vector.extract_strided_slice %207 {offsets = [0, 64], sizes = [2, 32], strides = [1, 1]} : vector<2x96xf32> to vector<2x32xf32>
    %229 = arith.mulf %218, %228 : vector<2x32xf32>
    %230 = arith.addf %227, %229 : vector<2x32xf32>
    %231 = math.tanh %230 : vector<2x32xf32>
    %cst_47 = arith.constant 1.000000e+00 : f32
    %232 = vector.broadcast %cst_47 : f32 to vector<2x32xf32>
    %233 = arith.subf %232, %226 : vector<2x32xf32>
    %234 = arith.mulf %233, %231 : vector<2x32xf32>
    %235 = arith.mulf %226, %203 : vector<2x32xf32>
    %236 = arith.addf %234, %235 : vector<2x32xf32>
    %c7_i32 = arith.constant 7 : i32
    %237 = arith.truncf %236 : vector<2x32xf32> to vector<2x32xbf16>
    %cst_48 = arith.constant dense<0.000000e+00> : vector<2x96xf32>
    %238 = tpu.matmul %237, %3, %cst_48 {dimension_numbers = #tpu.dot_dimension_numbers<[1], [0], [0], [1], [0, 0, 1, 1], [], []>} : vector<2x32xbf16>, vector<32x96xbf16>, vector<2x96xf32> -> vector<2x96xf32>
    %239 = vector.broadcast %4 : vector<1x96xf32> to vector<2x96xf32>
    %240 = arith.addf %238, %239 : vector<2x96xf32>
    %241 = arith.index_cast %c7_i32 : i32 to index
    %c0_49 = arith.constant 0 : index
    %c0_50 = arith.constant 0 : index
    %242 = vector.load %arg2[%241, %c0_49, %c0_50] : memref<8x2x96xf32, #tpu.memory_space<vmem>>, vector<1x2x96xf32>
    %243 = vector.shape_cast %242 : vector<1x2x96xf32> to vector<2x96xf32>
    %244 = vector.extract_strided_slice %243 {offsets = [0, 0], sizes = [2, 32], strides = [1, 1]} : vector<2x96xf32> to vector<2x32xf32>
    %245 = vector.extract_strided_slice %240 {offsets = [0, 0], sizes = [2, 32], strides = [1, 1]} : vector<2x96xf32> to vector<2x32xf32>
    %246 = arith.addf %244, %245 : vector<2x32xf32>
    %247 = arith.negf %246 : vector<2x32xf32>
    %248 = math.exp %247 : vector<2x32xf32>
    %cst_51 = arith.constant 1.000000e+00 : f32
    %249 = vector.broadcast %cst_51 : f32 to vector<2x32xf32>
    %250 = arith.addf %249, %248 : vector<2x32xf32>
    %251 = arith.divf %249, %250 : vector<2x32xf32>
    %252 = vector.extract_strided_slice %243 {offsets = [0, 32], sizes = [2, 32], strides = [1, 1]} : vector<2x96xf32> to vector<2x32xf32>
    %253 = vector.extract_strided_slice %240 {offsets = [0, 32], sizes = [2, 32], strides = [1, 1]} : vector<2x96xf32> to vector<2x32xf32>
    %254 = arith.addf %252, %253 : vector<2x32xf32>
    %255 = arith.negf %254 : vector<2x32xf32>
    %256 = math.exp %255 : vector<2x32xf32>
    %cst_52 = arith.constant 1.000000e+00 : f32
    %257 = vector.broadcast %cst_52 : f32 to vector<2x32xf32>
    %258 = arith.addf %257, %256 : vector<2x32xf32>
    %259 = arith.divf %257, %258 : vector<2x32xf32>
    %260 = vector.extract_strided_slice %243 {offsets = [0, 64], sizes = [2, 32], strides = [1, 1]} : vector<2x96xf32> to vector<2x32xf32>
    %261 = vector.extract_strided_slice %240 {offsets = [0, 64], sizes = [2, 32], strides = [1, 1]} : vector<2x96xf32> to vector<2x32xf32>
    %262 = arith.mulf %251, %261 : vector<2x32xf32>
    %263 = arith.addf %260, %262 : vector<2x32xf32>
    %264 = math.tanh %263 : vector<2x32xf32>
    %cst_53 = arith.constant 1.000000e+00 : f32
    %265 = vector.broadcast %cst_53 : f32 to vector<2x32xf32>
    %266 = arith.subf %265, %259 : vector<2x32xf32>
    %267 = arith.mulf %266, %264 : vector<2x32xf32>
    %268 = arith.mulf %259, %236 : vector<2x32xf32>
    %269 = arith.addf %267, %268 : vector<2x32xf32>
    %c8_i32 = arith.constant 8 : i32
    %c0_54 = arith.constant 0 : index
    %c0_55 = arith.constant 0 : index
    %270 = vector.load %arg10[%c0_54, %c0_55] : memref<2x32xf32, #tpu.memory_space<vmem>>, vector<2x32xf32>
    tpu.vector_store %arg10[%c0_54, %c0_55], %269 {strides = array<i32>} : memref<2x32xf32, #tpu.memory_space<vmem>>, vector<2x32xf32>,
    %c0_i32_56 = arith.constant 0 : i32
    %271 = arith.cmpi eq, %arg1, %c0_i32_56 : i32
    %272 = arith.extui %271 : i1 to i32
    %c0_i32_57 = arith.constant 0 : i32
    %273 = arith.cmpi ne, %272, %c0_i32_57 : i32
    scf.if %273 {
      %c0_58 = arith.constant 0 : index
      %c0_59 = arith.constant 0 : index
      %274 = vector.load %arg8[%c0_58, %c0_59] : memref<2x32xf32, #tpu.memory_space<vmem>>, vector<2x32xf32>
      tpu.vector_store %arg8[%c0_58, %c0_59], %269 {strides = array<i32>} : memref<2x32xf32, #tpu.memory_space<vmem>>, vector<2x32xf32>,
      %c0_60 = arith.constant 0 : index
      %c0_61 = arith.constant 0 : index
      %275 = vector.load %arg6[%c0_60, %c0_61] : memref<32x10xf32, #tpu.memory_space<vmem>>, vector<32x10xf32>
      %cst_62 = arith.constant dense<0.000000e+00> : vector<2x10xf32>
      %276 = tpu.matmul %269, %275, %cst_62 {dimension_numbers = #tpu.dot_dimension_numbers<[1], [0], [0], [1], [0, 0, 1, 1], [], []>} : vector<2x32xf32>, vector<32x10xf32>, vector<2x10xf32> -> vector<2x10xf32>
      %c0_63 = arith.constant 0 : index
      %c0_64 = arith.constant 0 : index
      %277 = vector.load %arg7[%c0_63, %c0_64] : memref<1x10xf32, #tpu.memory_space<vmem>>, vector<1x10xf32>
      %278 = vector.broadcast %277 : vector<1x10xf32> to vector<2x10xf32>
      %279 = arith.addf %276, %278 : vector<2x10xf32>
      %c0_65 = arith.constant 0 : index
      %c0_66 = arith.constant 0 : index
      %280 = vector.load %arg9[%c0_65, %c0_66] : memref<2x10xf32, #tpu.memory_space<vmem>>, vector<2x10xf32>
      tpu.vector_store %arg9[%c0_65, %c0_66], %279 {strides = array<i32>} : memref<2x10xf32, #tpu.memory_space<vmem>>, vector<2x10xf32>,
    } else {
    }
    return
  }
  func.func @transform_0(%arg0: i32, %arg1: i32) -> (i32, i32, i32) {
    %c0_i32 = arith.constant 0 : i32
    %c0_i32_0 = arith.constant 0 : i32
    return %arg1, %arg0, %c0_i32 : i32, i32, i32
  }
  func.func @transform_1(%arg0: i32, %arg1: i32) -> (i32, i32) {
    %c0_i32 = arith.constant 0 : i32
    %c0_i32_0 = arith.constant 0 : i32
    return %arg0, %c0_i32 : i32, i32
  }
  func.func @transform_2(%arg0: i32, %arg1: i32) -> (i32, i32) {
    %c0_i32 = arith.constant 0 : i32
    %c0_i32_0 = arith.constant 0 : i32
    %c0_i32_1 = arith.constant 0 : i32
    return %c0_i32, %c0_i32_0 : i32, i32
  }
  func.func @transform_3(%arg0: i32, %arg1: i32) -> (i32, i32) {
    %c0_i32 = arith.constant 0 : i32
    %c0_i32_0 = arith.constant 0 : i32
    %c0_i32_1 = arith.constant 0 : i32
    return %c0_i32, %c0_i32_0 : i32, i32
  }
  func.func @transform_4(%arg0: i32, %arg1: i32) -> (i32, i32) {
    %c0_i32 = arith.constant 0 : i32
    %c0_i32_0 = arith.constant 0 : i32
    %c0_i32_1 = arith.constant 0 : i32
    return %c0_i32, %c0_i32_0 : i32, i32
  }
  func.func @transform_5(%arg0: i32, %arg1: i32) -> (i32, i32) {
    %c0_i32 = arith.constant 0 : i32
    %c0_i32_0 = arith.constant 0 : i32
    %c0_i32_1 = arith.constant 0 : i32
    return %c0_i32, %c0_i32_0 : i32, i32
  }
  func.func @transform_6(%arg0: i32, %arg1: i32) -> (i32, i32) {
    %c0_i32 = arith.constant 0 : i32
    %c0_i32_0 = arith.constant 0 : i32
    return %arg0, %c0_i32 : i32, i32
  }
  func.func @transform_7(%arg0: i32, %arg1: i32) -> (i32, i32) {
    %c0_i32 = arith.constant 0 : i32
    %c0_i32_0 = arith.constant 0 : i32
    return %arg0, %c0_i32 : i32, i32
  }
}

</mosaic_0001>

<bundles_post_ra>
// kernel: _gru_forward_impl.4
= control target key start
LH: loop header
LB: loop body
LE: loop exit
PB: predicated region body
PF: predicated region fallthrough
CT: control target
= control target key end

     0   :  { %v105_v0 = vmov 0.0   ;;  %vm106_vm0 = vmmov 0   ;;  %vm37_vm1 = vcmask 130048   ;;  %vm82_vm2 = vcmask 785408   ;;  %s142_s1 = inlined_call_operand.vmem [shape: bf16[16,96], index: 1, kind: input, shape index: {}]   ;;  %s143_s0 = inlined_call_operand.vmem [shape: bf16[16,16], index: 0, kind: input, shape index: {}]   ;;  %s144_s2 = inlined_call_operand.vmem [shape: f32[1,96], index: 2, kind: input, shape index: {}]   ;;  %s145_s3 = inlined_call_operand.vmem [shape: f32[16,96], index: 3, kind: output, shape index: {}]  }
   0x1   :  { %95 = vmatprep.subr.bf16.mxu0 %v105_v0  ;;  %v103_v1 = vld [vmem:[%s142_s1] sm:$0xff]   ;;  %97 = vmatprep.mubr.msk.bf16.mxu0 %vm106_vm0, %v105_v0 }
   0x2   :  { %v104_v2 = vld [vmem:[%s143_s0] sm:$0xff]   ;;  %96 = vmatpush3.bf16.msra.mxu0 %v103_v1 }
   0x3   :  { %v89_v3 = vld [vmem:[%s144_s2] ss:$0 sm:$0xff] }
   0x5   :  { %98 = vmatmul.mubr.msk.bf16.vlgmr.msra.gmra.mxu0 %vm37_vm1, %v104_v2 }
  0xc5   :  { %v75_v4 = vpop.f32.mrf.mxu0 }
  0xc6   :  { %v76_v5 = vadd.f32 %v89_v3, %v75_v4 }
  0xc7   :  { %v99_v6 = vpop.f32.mrf.mxu0 }
  0xc8   :  { %83 = vst.msk [vmem:[%s145_s3] sm:$0xff] %vm82_vm2, %v76_v5 }
  0xc9   :  { %v78_v7 = vpop.f32.mrf.mxu0 }
  0xca   :  { %v79_v8 = vadd.f32 %v89_v3, %v78_v7 }
  0xcb   :  { %v100_v9 = vpop.f32.mrf.mxu0 }
  0xcc   :  { %84 = vst.msk [vmem:[%s145_s3 + $0x8] sm:$0xff] %vm82_vm2, %v79_v8 }

// kernel: _gru_forward_impl.6
= control target key start
LH: loop header
LB: loop body
LE: loop exit
PB: predicated region body
PF: predicated region fallthrough
CT: control target
= control target key end

     0   :  { %v118_v0 = vmov 0.0   ;;  %vm119_vm0 = vmmov 0   ;;  %vm45_vm1 = vcmask 261120   ;;  %vm90_vm2 = vcmask 785408   ;;  %s158_s1 = inlined_call_operand.vmem [shape: bf16[32,96], index: 1, kind: input, shape index: {}]   ;;  %s159_s0 = inlined_call_operand.vmem [shape: bf16[16,32], index: 0, kind: input, shape index: {}]   ;;  %s160_s2 = inlined_call_operand.vmem [shape: f32[1,96], index: 2, kind: input, shape index: {}]   ;;  %s161_s3 = inlined_call_operand.vmem [shape: f32[16,96], index: 3, kind: output, shape index: {}]  }
   0x1   :  { %105 = vmatprep.subr.bf16.mxu0 %v118_v0  ;;  %v115_v1 = vld [vmem:[%s158_s1 + $0x8] sm:$0xff]   ;;  %109 = vmatprep.mubr.msk.bf16.mxu0 %vm119_vm0, %v118_v0  ;;  %v116_v2 = vld [vmem:[%s158_s1] sm:$0xff]  }
   0x2   :  { %106 = vmatpush3.bf16.msra.mxu0 %v115_v1  ;;  %v117_v3 = vld [vmem:[%s159_s0] sm:$0xff]  }
   0x3   :  { %107 = vmatprep.subr.bf16.mxu0 %v118_v0  ;;  %v97_v4 = vld [vmem:[%s160_s2] ss:$0 sm:$0xff] }
   0x6   :  { %108 = vmatpush3.bf16.msra.mxu0 %v116_v2 }
   0x9   :  { %110 = vmatmul.mubr.msk.bf16.vlgmr.msra.gmra.mxu0 %vm45_vm1, %v117_v3 }
  0xc9   :  { %v83_v5 = vpop.f32.mrf.mxu0 }
  0xca   :  { %v84_v6 = vadd.f32 %v97_v4, %v83_v5 }
  0xcb   :  { %v111_v7 = vpop.f32.mrf.mxu0 }
  0xcc   :  { %91 = vst.msk [vmem:[%s161_s3] sm:$0xff] %vm90_vm2, %v84_v6 }
  0xcd   :  { %v86_v8 = vpop.f32.mrf.mxu0 }
  0xce   :  { %v87_v9 = vadd.f32 %v97_v4, %v86_v8 }
  0xcf   :  { %v112_v10 = vpop.f32.mrf.mxu0 }
  0xd0   :  { %92 = vst.msk [vmem:[%s161_s3 + $0x8] sm:$0xff] %vm90_vm2, %v87_v9 }

// kernel: _gru_forward_impl.7
= control target key start
LH: loop header
LB: loop body
LE: loop exit
PB: predicated region body
PF: predicated region fallthrough
CT: control target
= control target key end

     0   :  { %v982_v1 = vmov 0.0   ;;  %vm983_vm0 = vmmov 0   ;;  %vm32_vm1 = vcmask 254976   ;;  %s1197_s0 = inlined_call_operand.vmem [shape: f32[8,2,96], index: 0, kind: input, shape index: {}]   ;;  %s1198_s1 = inlined_call_operand.vmem [shape: f32[2,32], index: 1, kind: input, shape index: {}]   ;;  %s1199_s2 = inlined_call_operand.vmem [shape: bf16[32,96], index: 2, kind: input, shape index: {}]   ;;  %s1200_s3 = inlined_call_operand.vmem [shape: f32[1,96], index: 3, kind: input, shape index: {}]   ;;  %s1201_s4 = inlined_call_operand.vmem [shape: f32[32,10], index: 4, kind: input, shape index: {}]   ;;  %s1202_s5 = inlined_call_operand.vmem [shape: f32[1,10], index: 5, kind: input, shape index: {}]   ;;  %s1203_s6 = inlined_call_operand.vmem [shape: f32[2,32], index: 6, kind: output, shape index: {0}]   ;;  %s1204_s7 = inlined_call_operand.hbm [shape: f32[2,10], index: 7, kind: output, shape index: {1}]  }
   0x1   :  { %v1031_v0 = vld [vmem:[%s1199_s2 + $0x8] sm:$0xff]   ;;  %829 = vmatprep.subr.bf16.mxu0 %v982_v1  ;;  %837 = vmatprep.subr.bf16.mxu1 %v982_v1  ;;  %v1039_v2 = vld [vmem:[%s1199_s2] sm:$0xff]  }
   0x2   :  { %830 = vmatpush3.bf16.msra.mxu0 %v1031_v0  ;;  %833 = vmatprep.mubr.msk.bf16.mxu0 %vm983_vm0, %v982_v1  ;;  %v31_v3 = vld [vmem:[%s1198_s1] sm:$0x3] }
   0x3   :  { %831 = vmatprep.subr.bf16.mxu0 %v982_v1  ;;  %33 = vst.msk [vmem:[#allocation2] sm:$0x3] %vm32_vm1, %v31_v3  ;;  %838 = vmatpush3.bf16.msra.mxu1 %v1031_v0 }
   0x4   :  { %13 = vsyncpa [#allocation4], 0  ;;  %839 = vmatprep.subr.bf16.mxu1 %v982_v1  ;;  %841 = vmatprep.mubr.msk.bf16.mxu1 %vm983_vm0, %v982_v1  ;;  %vm59_vm2 = vcmask 261120   ;;  %v1066_v6 = vld [vmem:[%s1200_s3] ss:$0 sm:$0xff]  ;;  %s984_s30 = smov 64  }
   0x5   :  { %v103_v12 = vld [vmem:[%s1197_s0] sm:$0x3]  ;;  %s985_s3 = smov 96   ;;  %s986_s10 = smov 32   ;;  %v778_v36 = vld [vmem:[%s1197_s0 + $0x2] sm:$0x3] }
   0x6   :  { %832 = vmatpush3.bf16.msra.mxu0 %v1039_v2  ;;  %v781_v59 = vld [vmem:[%s1197_s0 + $0x4] sm:$0x3]  ;;  %vm752_vm3 = vcmask 74752  }
   0x7   :  { %840 = vmatpush3.bf16.msra.mxu1 %v1039_v2  ;;  %845 = vmatprep.subr.bf16.mxu0 %v982_v1 }
   0x8   :  { %853 = vmatprep.subr.bf16.mxu1 %v982_v1 }
   0xa   :  { %v39_v4 = vld [vmem:[#allocation2] sm:$0x3] }
   0xb   :  { %v40_v5 = vpack.c.bf16 %v39_v4, %v39_v4 }
   0xd   :  { %834 = vmatmul.mubr.msk.bf16.vlgmr.msra.gmra.mxu0 %vm59_vm2, %v40_v5 }
   0xe   :  { %846 = vmatpush3.bf16.msra.mxu0 %v1031_v0  ;;  %849 = vmatprep.mubr.msk.bf16.mxu0 %vm983_vm0, %v982_v1 }
   0xf   :  { %847 = vmatprep.subr.bf16.mxu0 %v982_v1 }
  0x12   :  { %848 = vmatpush3.bf16.msra.mxu0 %v1039_v2 }
  0x13   :  { %861 = vmatprep.subr.bf16.mxu0 %v982_v1 }
  0xcd   :  { %v97_v7 = vpop.f32.mrf.mxu0 }
  0xce   :  { %v98_v8 = vadd.f32 %v1066_v6, %v97_v7 }
  0xcf   :  { %v835_v9 = vpop.f32.mrf.mxu0 }
  0xd0   :  { %112 = vrot.lane.b32.xlu0 %v98_v8, %s984_s30  ;;  %v104_v13 = vadd.f32 %v103_v12, %v98_v8 }
  0xd1   :  { %v100_v10 = vpop.f32.mrf.mxu0 }
  0xd2   :  { %v776_v14 = vmul.f32 -1.442695, %v104_v13 }
  0xd3   :  { %v836_v11 = vpop.f32.mrf.mxu0 }
  0xd4   :  { %912 = vpow2.f32 %v776_v14 }
  0xe1   :  { %v913_v15 = vpop.eup %912 }
  0xe2   :  { %v108_v16 = vadd.f32 1.0, %v913_v15 }
  0xe4   :  { %914 = vrcp.f32 %v108_v16 }
  0xf1   :  { %v915_v17 = vpop.eup %914 }
  0xf2   :  { %v122_v24 = vsub.f32 1.0, %v915_v17 }
 0x142   :  { %v113_v18 = vpop.permute.xlu0 %112 }
 0x143   :  { %v115_v19 = vmul.f32 %v915_v17, %v113_v18 }
 0x145   :  { %117 = vrot.lane.b32.xlu0 %v115_v19, %s984_s30 }
 0x1b7   :  { %v118_v20 = vpop.permute.xlu0 %117 }
 0x1b8   :  { %v120_v21 = vadd.f32 %v118_v20, %v103_v12 }
 0x1ba   :  { %916 = vtanh.f32 %v120_v21 }
 0x1c7   :  { %v917_v22 = vpop.eup %916 }
 0x1c8   :  { %124 = vrot.lane.b32.xlu1 %v917_v22, %s985_s3  ;;  %v784_v22 = vld [vmem:[%s1197_s0 + $0x6] sm:$0x3] }
 0x1cc   :  { %129 = vrot.lane.b32.xlu1 %v39_v4, %s986_s10  ;;  %s987_s10 = smov [#allocation3]  }
 0x1cd   :  { %s762_s11 = sshll.u32 %s987_s10, 4  ;;  %s763_s11 = int_to_ptr.vmem [resolvable:$true] %s762_s11 }
 0x1ce   :  { %p965_p1 = scmp.lt.s32.totalorder %s763_s11, %s763_s11 }
 0x23a   :  { %v125_v23 = vpop.permute.xlu1 %124 }
 0x23b   :  { %v127_v26 = vmul.f32 %v125_v23, %v122_v24 }
 0x23e   :  { %v130_v25 = vpop.permute.xlu1 %129 }
 0x23f   :  { %v132_v27 = vmul.f32 %v915_v17, %v130_v25 }
 0x241   :  { %v133_v28 = vadd.f32 %v132_v27, %v127_v26 }
 0x243   :  { %v134_v29 = vpack.c.bf16 %v133_v28, %v133_v28 }
 0x245   :  { %136 = vrot.lane.b32.xlu0 %v134_v29, %s985_s3 }
 0x2b7   :  { %v137_v30 = vpop.permute.xlu0 %136 }
 0x2b8   :  { %842 = vmatmul.mubr.msk.bf16.vlgmr.msra.gmra.mxu1 %vm59_vm2, %v137_v30 }
 0x2b9   :  { %854 = vmatpush3.bf16.msra.mxu1 %v1031_v0  ;;  %857 = vmatprep.mubr.msk.bf16.mxu1 %vm983_vm0, %v982_v1 }
 0x2ba   :  { %855 = vmatprep.subr.bf16.mxu1 %v982_v1 }
 0x2bd   :  { %856 = vmatpush3.bf16.msra.mxu1 %v1039_v2 }
 0x2be   :  { %869 = vmatprep.subr.bf16.mxu1 %v982_v1 }
 0x378   :  { %v175_v31 = vpop.f32.mrf.mxu1 }
 0x379   :  { %v176_v32 = vadd.f32 %v1066_v6, %v175_v31 }
 0x37a   :  { %v843_v33 = vpop.f32.mrf.mxu1 }
 0x37b   :  { %191 = vrot.lane.b32.xlu1 %v176_v32, %s984_s30  ;;  %v183_v37 = vadd.f32 %v778_v36, %v176_v32 }
 0x37c   :  { %v178_v34 = vpop.f32.mrf.mxu1 }
 0x37d   :  { %v779_v38 = vmul.f32 -1.442695, %v183_v37 }
 0x37e   :  { %v844_v35 = vpop.f32.mrf.mxu1 }
 0x37f   :  { %918 = vpow2.f32 %v779_v38 }
 0x38c   :  { %v919_v39 = vpop.eup %918 }
 0x38d   :  { %v187_v40 = vadd.f32 1.0, %v919_v39 }
 0x38f   :  { %920 = vrcp.f32 %v187_v40 }
 0x39c   :  { %v921_v41 = vpop.eup %920 }
 0x39d   :  { %v201_v47 = vsub.f32 1.0, %v921_v41  ;;  %v207_v49 = vmul.f32 %v921_v41, %v133_v28 }
 0x3ed   :  { %v192_v42 = vpop.permute.xlu1 %191 }
 0x3ee   :  { %v194_v43 = vmul.f32 %v921_v41, %v192_v42 }
 0x3f0   :  { %196 = vrot.lane.b32.xlu0 %v194_v43, %s984_s30 }
 0x462   :  { %v197_v44 = vpop.permute.xlu0 %196 }
 0x463   :  { %v199_v45 = vadd.f32 %v778_v36, %v197_v44 }
 0x465   :  { %922 = vtanh.f32 %v199_v45  ;;  %v787_v45 = vld [vmem:[%s1197_s0 + $0x8] sm:$0x3] }
 0x472   :  { %v923_v46 = vpop.eup %922 }
 0x473   :  { %203 = vrot.lane.b32.xlu1 %v923_v46, %s985_s3 }
 0x4e5   :  { %v204_v48 = vpop.permute.xlu1 %203 }
 0x4e6   :  { %v206_v50 = vmul.f32 %v204_v48, %v201_v47 }
 0x4e8   :  { %v208_v51 = vadd.f32 %v207_v49, %v206_v50 }
 0x4ea   :  { %v209_v52 = vpack.c.bf16 %v208_v51, %v208_v51 }
 0x4ec   :  { %211 = vrot.lane.b32.xlu0 %v209_v52, %s985_s3 }
 0x55e   :  { %v212_v53 = vpop.permute.xlu0 %211 }
 0x55f   :  { %850 = vmatmul.mubr.msk.bf16.vlgmr.msra.gmra.mxu0 %vm59_vm2, %v212_v53 }
 0x560   :  { %862 = vmatpush3.bf16.msra.mxu0 %v1031_v0  ;;  %865 = vmatprep.mubr.msk.bf16.mxu0 %vm983_vm0, %v982_v1 }
 0x561   :  { %863 = vmatprep.subr.bf16.mxu0 %v982_v1 }
 0x564   :  { %864 = vmatpush3.bf16.msra.mxu0 %v1039_v2 }
 0x565   :  { %877 = vmatprep.subr.bf16.mxu0 %v982_v1 }
 0x61f   :  { %v250_v54 = vpop.f32.mrf.mxu0 }
 0x620   :  { %v251_v55 = vadd.f32 %v1066_v6, %v250_v54 }
 0x621   :  { %v851_v56 = vpop.f32.mrf.mxu0 }
 0x622   :  { %266 = vrot.lane.b32.xlu1 %v251_v55, %s984_s30  ;;  %v258_v60 = vadd.f32 %v781_v59, %v251_v55 }
 0x623   :  { %v253_v57 = vpop.f32.mrf.mxu0 }
 0x624   :  { %v782_v61 = vmul.f32 -1.442695, %v258_v60 }
 0x625   :  { %v852_v58 = vpop.f32.mrf.mxu0 }
 0x626   :  { %924 = vpow2.f32 %v782_v61 }
 0x633   :  { %v925_v62 = vpop.eup %924 }
 0x634   :  { %v262_v63 = vadd.f32 1.0, %v925_v62 }
 0x636   :  { %926 = vrcp.f32 %v262_v63 }
 0x643   :  { %v927_v3 = vpop.eup %926 }
 0x644   :  { %v276_v10 = vsub.f32 1.0, %v927_v3  ;;  %v282_v12 = vmul.f32 %v927_v3, %v208_v51 }
 0x694   :  { %v267_v4 = vpop.permute.xlu1 %266 }
 0x695   :  { %v269_v5 = vmul.f32 %v927_v3, %v267_v4 }
 0x697   :  { %271 = vrot.lane.b32.xlu0 %v269_v5, %s984_s30 }
 0x709   :  { %v272_v7 = vpop.permute.xlu0 %271 }
 0x70a   :  { %v274_v8 = vadd.f32 %v781_v59, %v272_v7 }
 0x70c   :  { %928 = vtanh.f32 %v274_v8  ;;  %v790_v8 = vld [vmem:[%s1197_s0 + $0xa] sm:$0x3] }
 0x719   :  { %v929_v9 = vpop.eup %928 }
 0x71a   :  { %278 = vrot.lane.b32.xlu1 %v929_v9, %s985_s3 }
 0x78c   :  { %v279_v11 = vpop.permute.xlu1 %278 }
 0x78d   :  { %v281_v13 = vmul.f32 %v279_v11, %v276_v10 }
 0x78f   :  { %v283_v14 = vadd.f32 %v282_v12, %v281_v13 }
 0x791   :  { %v284_v15 = vpack.c.bf16 %v283_v14, %v283_v14 }
 0x793   :  { %286 = vrot.lane.b32.xlu0 %v284_v15, %s985_s3 }
 0x805   :  { %v287_v16 = vpop.permute.xlu0 %286 }
 0x806   :  { %858 = vmatmul.mubr.msk.bf16.vlgmr.msra.gmra.mxu1 %vm59_vm2, %v287_v16 }
 0x807   :  { %870 = vmatpush3.bf16.msra.mxu1 %v1031_v0  ;;  %873 = vmatprep.mubr.msk.bf16.mxu1 %vm983_vm0, %v982_v1 }
 0x808   :  { %871 = vmatprep.subr.bf16.mxu1 %v982_v1 }
 0x80b   :  { %872 = vmatpush3.bf16.msra.mxu1 %v1039_v2 }
 0x80c   :  { %885 = vmatprep.subr.bf16.mxu1 %v982_v1 }
 0x8c6   :  { %v325_v17 = vpop.f32.mrf.mxu1 }
 0x8c7   :  { %v326_v18 = vadd.f32 %v1066_v6, %v325_v17 }
 0x8c8   :  { %v859_v19 = vpop.f32.mrf.mxu1 }
 0x8c9   :  { %341 = vrot.lane.b32.xlu1 %v326_v18, %s984_s30  ;;  %v333_v23 = vadd.f32 %v784_v22, %v326_v18 }
 0x8ca   :  { %v328_v20 = vpop.f32.mrf.mxu1 }
 0x8cb   :  { %v785_v24 = vmul.f32 -1.442695, %v333_v23 }
 0x8cc   :  { %v860_v21 = vpop.f32.mrf.mxu1 }
 0x8cd   :  { %930 = vpow2.f32 %v785_v24 }
 0x8da   :  { %v931_v25 = vpop.eup %930 }
 0x8db   :  { %v337_v26 = vadd.f32 1.0, %v931_v25 }
 0x8dd   :  { %932 = vrcp.f32 %v337_v26 }
 0x8ea   :  { %v933_v27 = vpop.eup %932 }
 0x8eb   :  { %v351_v33 = vsub.f32 1.0, %v933_v27  ;;  %v357_v35 = vmul.f32 %v933_v27, %v283_v14 }
 0x93b   :  { %v342_v28 = vpop.permute.xlu1 %341 }
 0x93c   :  { %v344_v29 = vmul.f32 %v933_v27, %v342_v28 }
 0x93e   :  { %346 = vrot.lane.b32.xlu0 %v344_v29, %s984_s30  ;;  %v793_v29 = vld [vmem:[%s1197_s0 + $0xc] sm:$0x3] }
 0x9b0   :  { %v347_v30 = vpop.permute.xlu0 %346 }
 0x9b1   :  { %v349_v31 = vadd.f32 %v784_v22, %v347_v30 }
 0x9b3   :  { %934 = vtanh.f32 %v349_v31 }
 0x9c0   :  { %v935_v32 = vpop.eup %934 }
 0x9c1   :  { %353 = vrot.lane.b32.xlu1 %v935_v32, %s985_s3 }
 0xa33   :  { %v354_v34 = vpop.permute.xlu1 %353 }
 0xa34   :  { %v356_v36 = vmul.f32 %v354_v34, %v351_v33 }
 0xa36   :  { %v358_v37 = vadd.f32 %v357_v35, %v356_v36 }
 0xa38   :  { %v359_v38 = vpack.c.bf16 %v358_v37, %v358_v37 }
 0xa3a   :  { %361 = vrot.lane.b32.xlu0 %v359_v38, %s985_s3 }
 0xaac   :  { %v362_v39 = vpop.permute.xlu0 %361 }
 0xaad   :  { %866 = vmatmul.mubr.msk.bf16.vlgmr.msra.gmra.mxu0 %vm59_vm2, %v362_v39 }
 0xaae   :  { %878 = vmatpush3.bf16.msra.mxu0 %v1031_v0  ;;  %881 = vmatprep.mubr.msk.bf16.mxu0 %vm983_vm0, %v982_v1 }
 0xaaf   :  { %879 = vmatprep.subr.bf16.mxu0 %v982_v1 }
 0xab2   :  { %880 = vmatpush3.bf16.msra.mxu0 %v1039_v2 }
 0xab3   :  { %893 = vmatprep.subr.mxu0 %v982_v1 }
 0xb6d   :  { %v400_v40 = vpop.f32.mrf.mxu0 }
 0xb6e   :  { %v401_v41 = vadd.f32 %v1066_v6, %v400_v40 }
 0xb6f   :  { %v867_v42 = vpop.f32.mrf.mxu0 }
 0xb70   :  { %416 = vrot.lane.b32.xlu1 %v401_v41, %s984_s30  ;;  %v408_v46 = vadd.f32 %v787_v45, %v401_v41 }
 0xb71   :  { %v403_v43 = vpop.f32.mrf.mxu0 }
 0xb72   :  { %v788_v47 = vmul.f32 -1.442695, %v408_v46 }
 0xb73   :  { %v868_v44 = vpop.f32.mrf.mxu0 }
 0xb74   :  { %936 = vpow2.f32 %v788_v47 }
 0xb81   :  { %v937_v48 = vpop.eup %936 }
 0xb82   :  { %v412_v49 = vadd.f32 1.0, %v937_v48 }
 0xb84   :  { %938 = vrcp.f32 %v412_v49 }
 0xb91   :  { %v939_v50 = vpop.eup %938 }
 0xb92   :  { %v426_v56 = vsub.f32 1.0, %v939_v50  ;;  %v432_v58 = vmul.f32 %v939_v50, %v358_v37 }
 0xbe2   :  { %v417_v51 = vpop.permute.xlu1 %416 }
 0xbe3   :  { %v419_v52 = vmul.f32 %v939_v50, %v417_v51 }
 0xbe5   :  { %421 = vrot.lane.b32.xlu0 %v419_v52, %s984_s30  ;;  %v796_v52 = vld [vmem:[%s1197_s0 + $0xe] sm:$0x3] }
 0xc57   :  { %v422_v53 = vpop.permute.xlu0 %421 }
 0xc58   :  { %v424_v54 = vadd.f32 %v787_v45, %v422_v53 }
 0xc5a   :  { %940 = vtanh.f32 %v424_v54 }
 0xc67   :  { %v941_v55 = vpop.eup %940 }
 0xc68   :  { %428 = vrot.lane.b32.xlu1 %v941_v55, %s985_s3 }
 0xcda   :  { %v429_v57 = vpop.permute.xlu1 %428 }
 0xcdb   :  { %v431_v59 = vmul.f32 %v429_v57, %v426_v56 }
 0xcdd   :  { %v433_v60 = vadd.f32 %v432_v58, %v431_v59 }
 0xcdf   :  { %v434_v61 = vpack.c.bf16 %v433_v60, %v433_v60 }
 0xce1   :  { %436 = vrot.lane.b32.xlu0 %v434_v61, %s985_s3  ;;  %v672_v61 = vld [vmem:[%s1201_s4 + $0x18] sm:$0xff] }
 0xd53   :  { %v437_v62 = vpop.permute.xlu0 %436 }
 0xd54   :  { %874 = vmatmul.mubr.msk.bf16.vlgmr.msra.gmra.mxu1 %vm59_vm2, %v437_v62  ;;  %v671_v62 = vld [vmem:[%s1201_s4 + $0x10] sm:$0xff] }
 0xd55   :  { %886 = vmatpush3.bf16.msra.mxu1 %v1031_v0  ;;  %889 = vmatprep.mubr.msk.bf16.mxu1 %vm983_vm0, %v982_v1 }
 0xd56   :  { %887 = vmatprep.subr.bf16.mxu1 %v982_v1 }
 0xd59   :  { %888 = vmatpush3.bf16.msra.mxu1 %v1039_v2 }
 0xe14   :  { %v475_v63 = vpop.f32.mrf.mxu1 }
 0xe15   :  { %v476_v3 = vadd.f32 %v1066_v6, %v475_v63  ;;  %v670_v63 = vld [vmem:[%s1201_s4 + $0x8] sm:$0xff] }
 0xe16   :  { %v875_v4 = vpop.f32.mrf.mxu1 }
 0xe17   :  { %491 = vrot.lane.b32.xlu1 %v476_v3, %s984_s30  ;;  %v483_v0 = vadd.f32 %v790_v8, %v476_v3  ;;  %v669_v3 = vld [vmem:[%s1201_s4] sm:$0xff] }
 0xe18   :  { %v478_v5 = vpop.f32.mrf.mxu1 }
 0xe19   :  { %v791_v9 = vmul.f32 -1.442695, %v483_v0 }
 0xe1a   :  { %v876_v7 = vpop.f32.mrf.mxu1 }
 0xe1b   :  { %942 = vpow2.f32 %v791_v9 }
 0xe28   :  { %v943_v10 = vpop.eup %942 }
 0xe29   :  { %v487_v11 = vadd.f32 1.0, %v943_v10 }
 0xe2b   :  { %944 = vrcp.f32 %v487_v11 }
 0xe38   :  { %v945_v12 = vpop.eup %944 }
 0xe39   :  { %v501_v17 = vsub.f32 1.0, %v945_v12  ;;  %v507_v19 = vmul.f32 %v945_v12, %v433_v60 }
 0xe89   :  { %v492_v2 = vpop.permute.xlu1 %491 }
 0xe8a   :  { %v494_v13 = vmul.f32 %v945_v12, %v492_v2 }
 0xe8c   :  { %496 = vrot.lane.b32.xlu0 %v494_v13, %s984_s30 }
 0xefe   :  { %v497_v14 = vpop.permute.xlu0 %496 }
 0xeff   :  { %v499_v15 = vadd.f32 %v790_v8, %v497_v14 }
 0xf01   :  { %946 = vtanh.f32 %v499_v15 }
 0xf0e   :  { %v947_v16 = vpop.eup %946 }
 0xf0f   :  { %503 = vrot.lane.b32.xlu1 %v947_v16, %s985_s3 }
 0xf81   :  { %v504_v18 = vpop.permute.xlu1 %503 }
 0xf82   :  { %v506_v20 = vmul.f32 %v504_v18, %v501_v17 }
 0xf84   :  { %v508_v21 = vadd.f32 %v507_v19, %v506_v20 }
 0xf86   :  { %v509_v22 = vpack.c.bf16 %v508_v21, %v508_v21 }
 0xf88   :  { %511 = vrot.lane.b32.xlu0 %v509_v22, %s985_s3 }
 0xffa   :  { %v512_v23 = vpop.permute.xlu0 %511 }
 0xffb   :  { %882 = vmatmul.mubr.msk.bf16.vlgmr.msra.gmra.mxu0 %vm59_vm2, %v512_v23 }
 0xffc   :  { %901 = vmatprep.mubr.msk.f32.mxu0 %vm983_vm0, %v982_v1  ;;  %894 = vmatpush3.msra.mxu0 %v672_v61 }
 0xffd   :  { %895 = vmatprep.subr.mxu0 %v982_v1 }
 0xffe   :  { %896 = vmatpush3.msra.mxu0 %v671_v62 }
 0xfff   :  { %897 = vmatprep.subr.mxu0 %v982_v1 }
0x1000   :  { %898 = vmatpush3.msra.mxu0 %v670_v63 }
0x1001   :  { %899 = vmatprep.subr.mxu0 %v982_v1  ;;  %v798_v1 = vld [vmem:[%s1202_s5] ss:$0 sm:$0xff] }
0x1002   :  { %900 = vmatpush3.msra.mxu0 %v669_v3 }
0x10bb   :  { %v550_v24 = vpop.f32.mrf.mxu0 }
0x10bc   :  { %v551_v25 = vadd.f32 %v1066_v6, %v550_v24 }
0x10bd   :  { %v883_v26 = vpop.f32.mrf.mxu0 }
0x10be   :  { %566 = vrot.lane.b32.xlu1 %v551_v25, %s984_s30  ;;  %v558_v30 = vadd.f32 %v793_v29, %v551_v25 }
0x10bf   :  { %v553_v27 = vpop.f32.mrf.mxu0 }
0x10c0   :  { %v794_v31 = vmul.f32 -1.442695, %v558_v30 }
0x10c1   :  { %v884_v28 = vpop.f32.mrf.mxu0 }
0x10c2   :  { %948 = vpow2.f32 %v794_v31 }
0x10cf   :  { %v949_v32 = vpop.eup %948 }
0x10d0   :  { %v562_v33 = vadd.f32 1.0, %v949_v32 }
0x10d2   :  { %950 = vrcp.f32 %v562_v33 }
0x10df   :  { %v951_v34 = vpop.eup %950 }
0x10e0   :  { %v576_v40 = vsub.f32 1.0, %v951_v34  ;;  %v582_v42 = vmul.f32 %v951_v34, %v508_v21 }
0x1130   :  { %v567_v35 = vpop.permute.xlu1 %566 }
0x1131   :  { %v569_v36 = vmul.f32 %v951_v34, %v567_v35 }
0x1133   :  { %571 = vrot.lane.b32.xlu0 %v569_v36, %s984_s30 }
0x11a5   :  { %v572_v37 = vpop.permute.xlu0 %571 }
0x11a6   :  { %v574_v38 = vadd.f32 %v793_v29, %v572_v37 }
0x11a8   :  { %952 = vtanh.f32 %v574_v38 }
0x11b5   :  { %v953_v39 = vpop.eup %952 }
0x11b6   :  { %578 = vrot.lane.b32.xlu1 %v953_v39, %s985_s3 }
0x1228   :  { %v579_v41 = vpop.permute.xlu1 %578 }
0x1229   :  { %v581_v43 = vmul.f32 %v579_v41, %v576_v40 }
0x122b   :  { %v583_v44 = vadd.f32 %v582_v42, %v581_v43 }
0x122d   :  { %v584_v45 = vpack.c.bf16 %v583_v44, %v583_v44 }
0x122f   :  { %586 = vrot.lane.b32.xlu0 %v584_v45, %s985_s3 }
0x12a1   :  { %v587_v46 = vpop.permute.xlu0 %586 }
0x12a2   :  { %890 = vmatmul.mubr.msk.bf16.vlgmr.msra.gmra.mxu1 %vm59_vm2, %v587_v46 }
0x1362   :  { %v625_v47 = vpop.f32.mrf.mxu1 }
0x1363   :  { %v626_v48 = vadd.f32 %v1066_v6, %v625_v47 }
0x1364   :  { %v891_v49 = vpop.f32.mrf.mxu1 }
0x1365   :  { %641 = vrot.lane.b32.xlu1 %v626_v48, %s984_s30  ;;  %v633_v53 = vadd.f32 %v796_v52, %v626_v48 }
0x1366   :  { %v628_v50 = vpop.f32.mrf.mxu1 }
0x1367   :  { %v797_v54 = vmul.f32 -1.442695, %v633_v53 }
0x1368   :  { %v892_v51 = vpop.f32.mrf.mxu1 }
0x1369   :  { %954 = vpow2.f32 %v797_v54 }
0x1376   :  { %v955_v55 = vpop.eup %954 }
0x1377   :  { %v637_v56 = vadd.f32 1.0, %v955_v55 }
0x1379   :  { %956 = vrcp.f32 %v637_v56 }
0x1386   :  { %v957_v57 = vpop.eup %956 }
0x1387   :  { %v651_v5 = vsub.f32 1.0, %v957_v57  ;;  %v657_v8 = vmul.f32 %v957_v57, %v583_v44 }
0x13d7   :  { %v642_v58 = vpop.permute.xlu1 %641 }
0x13d8   :  { %v644_v59 = vmul.f32 %v957_v57, %v642_v58 }
0x13da   :  { %646 = vrot.lane.b32.xlu0 %v644_v59, %s984_s30 }
0x144c   :  { %v647_v6 = vpop.permute.xlu0 %646 }
0x144d   :  { %v649_v60 = vadd.f32 %v796_v52, %v647_v6 }
0x144f   :  { %958 = vtanh.f32 %v649_v60 }
0x145c   :  { %v959_v4 = vpop.eup %958 }
0x145d   :  { %653 = vrot.lane.b32.xlu1 %v959_v4, %s985_s3 }
0x14cf   :  { %v654_v7 = vpop.permute.xlu1 %653 }
0x14d0   :  { %v656_v0 = vmul.f32 %v654_v7, %v651_v5 }
0x14d2   :  { %v658_v9 = vadd.f32 %v657_v8, %v656_v0 }
0x14d4   :  { %660 = vrot.lane.b32.xlu0 %v658_v9, %s985_s3  ;;  %s960_s3 = scalar_lea.vmem %s763_s11, 32 }
0x14d5   :  { %p961_p0 = scmp.ne.s32.totalorder %s763_s11, %s960_s3  ;;  %p966_p2 = scmp.lt.s32.totalorder %s960_s3, %s960_s3 }
0x14d7   :  { %p967_p3 = por %p966_p2, %p965_p1 }
0x14d9   :  { %p968_p4 = pnand %p967_p3, %p961_p0 }
0x1546   :  { %v661_v10 = vpop.permute.xlu0 %660 }
0x1547   :  { %664 = vst.msk [vmem:[#allocation2] sm:$0x3] %vm32_vm1, %v661_v10  ;;  %668 = vst.msk [vmem:[%s1203_s6] sm:$0x3] %vm32_vm1, %v661_v10  ;;  %902 = vmatmul.mubr.msk.f32.vlgmr.msra.gmra.mxu0 %vm59_vm2, %v661_v10 }
0x1607   :  { %v748_v11 = vpop.f32.mrf.mxu0 }
0x1608   :  { %v749_v12 = vadd.f32 %v798_v1, %v748_v11 }
0x1609   :  { %v903_v2 = vpop.f32.mrf.mxu0 }
0x160a   :  { %753 = vst.msk [vmem:[#allocation3] sm:$0x3] %vm752_vm3, %v749_v12 }
0x160b   :  { %971 = shalt.err (!%p968_p4)
}
0x160c   :  { %765 = dma.vmem_to_hbm [thread:$0]  %s763_s11, 32, %s1204_s7, [#allocation4]  }
0x160d   :  { %980 = dma.done.wait [#allocation4], 32  }
0x160e   :  { %981 = vsyncadd [#allocation4], 4294967264 }
0x160f   :  { %771 = vsyncpa [#allocation4], 1 }

// kernel: _gru_forward_impl.5
= control target key start
LH: loop header
LB: loop body
LE: loop exit
PB: predicated region body
PF: predicated region fallthrough
CT: control target
= control target key end

     0   :  { %v1001_v0 = vmov 0.0   ;;  %vm1002_vm0 = vmmov 0   ;;  %vm25_vm1 = vcmask 254976   ;;  %vm52_vm2 = vcmask 261120   ;;  %s1003_s24 = smov 64   ;;  %s1005_s27 = smov 32   ;;  %s1250_s2 = inlined_call_operand.vmem [shape: bf16[32,96], index: 2, kind: input, shape index: {}]   ;;  %s1251_s1 = inlined_call_operand.vmem [shape: f32[2,32], index: 1, kind: input, shape index: {}]   ;;  %s1252_s3 = inlined_call_operand.vmem [shape: f32[1,96], index: 3, kind: input, shape index: {}]   ;;  %s1253_s0 = inlined_call_operand.vmem [shape: f32[8,2,96], index: 0, kind: input, shape index: {}]   ;;  %s1254_s4 = inlined_call_operand.vmem [shape: bf16[8,2,32], index: 4, kind: output, shape index: {0}]   ;;  %s1255_s5 = inlined_call_operand.vmem [shape: f32[2,32], index: 5, kind: output, shape index: {1}]  }
   0x1   :  { %881 = vmatprep.subr.bf16.mxu0 %v1001_v0  ;;  %v1041_v1 = vld [vmem:[%s1250_s2 + $0x8] sm:$0xff]   ;;  %885 = vmatprep.mubr.msk.bf16.mxu0 %vm1002_vm0, %v1001_v0  ;;  %v1052_v2 = vld [vmem:[%s1250_s2] sm:$0xff]   ;;  %vm146_vm3 = vcmask 253952  }
   0x2   :  { %889 = vmatprep.subr.bf16.mxu1 %v1001_v0  ;;  %893 = vmatprep.mubr.msk.bf16.mxu1 %vm1002_vm0, %v1001_v0  ;;  %v24_v3 = vld [vmem:[%s1251_s1] sm:$0x3]  ;;  %v830_v36 = vld [vmem:[%s1253_s0 + $0x2] sm:$0x3]  ;;  %v834_v59 = vld [vmem:[%s1253_s0 + $0x4] sm:$0x3] }
   0x3   :  { %882 = vmatpush3.bf16.msra.mxu0 %v1041_v1  ;;  %890 = vmatpush3.bf16.msra.mxu1 %v1041_v1  ;;  %26 = vst.msk [vmem:[#allocation2] sm:$0x3] %vm25_vm1, %v24_v3  ;;  %v1075_v6 = vld [vmem:[%s1252_s3] ss:$0 sm:$0xff]  ;;  %s1004_s3 = smov 96  }
   0x4   :  { %883 = vmatprep.subr.bf16.mxu0 %v1001_v0  ;;  %891 = vmatprep.subr.bf16.mxu1 %v1001_v0  ;;  %v96_v12 = vld [vmem:[%s1253_s0] sm:$0x3] }
   0x7   :  { %884 = vmatpush3.bf16.msra.mxu0 %v1052_v2  ;;  %892 = vmatpush3.bf16.msra.mxu1 %v1052_v2 }
   0x8   :  { %897 = vmatprep.subr.bf16.mxu0 %v1001_v0  ;;  %905 = vmatprep.subr.bf16.mxu1 %v1001_v0 }
   0xa   :  { %v32_v4 = vld [vmem:[#allocation2] sm:$0x3] }
   0xb   :  { %v33_v5 = vpack.c.bf16 %v32_v4, %v32_v4 }
   0xd   :  { %886 = vmatmul.mubr.msk.bf16.vlgmr.msra.gmra.mxu0 %vm52_vm2, %v33_v5 }
   0xe   :  { %898 = vmatpush3.bf16.msra.mxu0 %v1041_v1  ;;  %901 = vmatprep.mubr.msk.bf16.mxu0 %vm1002_vm0, %v1001_v0 }
   0xf   :  { %899 = vmatprep.subr.bf16.mxu0 %v1001_v0 }
  0x12   :  { %900 = vmatpush3.bf16.msra.mxu0 %v1052_v2 }
  0x13   :  { %913 = vmatprep.subr.bf16.mxu0 %v1001_v0 }
  0xcd   :  { %v90_v7 = vpop.f32.mrf.mxu0 }
  0xce   :  { %v91_v8 = vadd.f32 %v1075_v6, %v90_v7 }
  0xcf   :  { %v887_v9 = vpop.f32.mrf.mxu0 }
  0xd0   :  { %105 = vrot.lane.b32.xlu0 %v91_v8, %s1003_s24  ;;  %v97_v13 = vadd.f32 %v96_v12, %v91_v8 }
  0xd1   :  { %v93_v10 = vpop.f32.mrf.mxu0 }
  0xd2   :  { %v828_v14 = vmul.f32 -1.442695, %v97_v13 }
  0xd3   :  { %v888_v11 = vpop.f32.mrf.mxu0 }
  0xd4   :  { %953 = vpow2.f32 %v828_v14 }
  0xe1   :  { %v954_v15 = vpop.eup %953 }
  0xe2   :  { %v101_v16 = vadd.f32 1.0, %v954_v15 }
  0xe4   :  { %955 = vrcp.f32 %v101_v16 }
  0xf1   :  { %v956_v17 = vpop.eup %955 }
  0xf2   :  { %v115_v24 = vsub.f32 1.0, %v956_v17 }
 0x142   :  { %v106_v18 = vpop.permute.xlu0 %105 }
 0x143   :  { %v108_v19 = vmul.f32 %v956_v17, %v106_v18 }
 0x145   :  { %110 = vrot.lane.b32.xlu0 %v108_v19, %s1003_s24 }
 0x1b7   :  { %v111_v20 = vpop.permute.xlu0 %110 }
 0x1b8   :  { %v113_v21 = vadd.f32 %v111_v20, %v96_v12 }
 0x1ba   :  { %957 = vtanh.f32 %v113_v21 }
 0x1c7   :  { %v958_v22 = vpop.eup %957 }
 0x1c8   :  { %117 = vrot.lane.b32.xlu1 %v958_v22, %s1004_s3  ;;  %v838_v22 = vld [vmem:[%s1253_s0 + $0x6] sm:$0x3] }
 0x1cc   :  { %122 = vrot.lane.b32.xlu1 %v32_v4, %s1005_s27 }
 0x23a   :  { %v118_v23 = vpop.permute.xlu1 %117 }
 0x23b   :  { %v120_v26 = vmul.f32 %v118_v23, %v115_v24 }
 0x23e   :  { %v123_v25 = vpop.permute.xlu1 %122 }
 0x23f   :  { %v125_v27 = vmul.f32 %v956_v17, %v123_v25 }
 0x241   :  { %v126_v28 = vadd.f32 %v125_v27, %v120_v26 }
 0x243   :  { %v1084_v29 = vpack.c.bf16 %v126_v28, %v126_v28 }
 0x245   :  { %148 = vrot.lane.b32.xlu0 %v1084_v29, %s1004_s3 }
 0x2b7   :  { %v149_v30 = vpop.permute.xlu0 %148 }
 0x2b8   :  { %894 = vmatmul.mubr.msk.bf16.vlgmr.msra.gmra.mxu1 %vm52_vm2, %v149_v30 }
 0x2b9   :  { %906 = vmatpush3.bf16.msra.mxu1 %v1041_v1  ;;  %909 = vmatprep.mubr.msk.bf16.mxu1 %vm1002_vm0, %v1001_v0 }
 0x2ba   :  { %907 = vmatprep.subr.bf16.mxu1 %v1001_v0 }
 0x2bd   :  { %908 = vmatpush3.bf16.msra.mxu1 %v1052_v2 }
 0x2be   :  { %921 = vmatprep.subr.bf16.mxu1 %v1001_v0 }
 0x378   :  { %v187_v31 = vpop.f32.mrf.mxu1 }
 0x379   :  { %v188_v32 = vadd.f32 %v1075_v6, %v187_v31 }
 0x37a   :  { %v895_v33 = vpop.f32.mrf.mxu1 }
 0x37b   :  { %203 = vrot.lane.b32.xlu1 %v188_v32, %s1003_s24  ;;  %v195_v37 = vadd.f32 %v830_v36, %v188_v32 }
 0x37c   :  { %v190_v34 = vpop.f32.mrf.mxu1 }
 0x37d   :  { %v831_v38 = vmul.f32 -1.442695, %v195_v37 }
 0x37e   :  { %v896_v35 = vpop.f32.mrf.mxu1 }
 0x37f   :  { %959 = vpow2.f32 %v831_v38 }
 0x38c   :  { %v960_v39 = vpop.eup %959 }
 0x38d   :  { %v199_v40 = vadd.f32 1.0, %v960_v39 }
 0x38f   :  { %961 = vrcp.f32 %v199_v40 }
 0x39c   :  { %v962_v41 = vpop.eup %961 }
 0x39d   :  { %v213_v47 = vsub.f32 1.0, %v962_v41  ;;  %v219_v49 = vmul.f32 %v962_v41, %v126_v28 }
 0x3ed   :  { %v204_v42 = vpop.permute.xlu1 %203 }
 0x3ee   :  { %v206_v43 = vmul.f32 %v962_v41, %v204_v42 }
 0x3f0   :  { %208 = vrot.lane.b32.xlu0 %v206_v43, %s1003_s24 }
 0x462   :  { %v209_v44 = vpop.permute.xlu0 %208 }
 0x463   :  { %v211_v45 = vadd.f32 %v830_v36, %v209_v44 }
 0x465   :  { %963 = vtanh.f32 %v211_v45 }
 0x472   :  { %v964_v46 = vpop.eup %963 }
 0x473   :  { %215 = vrot.lane.b32.xlu1 %v964_v46, %s1004_s3  ;;  %v842_v46 = vld [vmem:[%s1253_s0 + $0x8] sm:$0x3] }
 0x4e5   :  { %v216_v48 = vpop.permute.xlu1 %215 }
 0x4e6   :  { %v218_v50 = vmul.f32 %v216_v48, %v213_v47 }
 0x4e8   :  { %v220_v51 = vadd.f32 %v219_v49, %v218_v50 }
 0x4ea   :  { %v1102_v52 = vpack.c.bf16 %v220_v51, %v220_v51 }
 0x4ec   :  { %242 = vrot.lane.b32.xlu0 %v1102_v52, %s1004_s3 }
 0x55e   :  { %v243_v53 = vpop.permute.xlu0 %242 }
 0x55f   :  { %902 = vmatmul.mubr.msk.bf16.vlgmr.msra.gmra.mxu0 %vm52_vm2, %v243_v53 }
 0x560   :  { %914 = vmatpush3.bf16.msra.mxu0 %v1041_v1  ;;  %917 = vmatprep.mubr.msk.bf16.mxu0 %vm1002_vm0, %v1001_v0 }
 0x561   :  { %915 = vmatprep.subr.bf16.mxu0 %v1001_v0 }
 0x564   :  { %916 = vmatpush3.bf16.msra.mxu0 %v1052_v2 }
 0x565   :  { %929 = vmatprep.subr.bf16.mxu0 %v1001_v0 }
 0x61f   :  { %v281_v54 = vpop.f32.mrf.mxu0 }
 0x620   :  { %v282_v55 = vadd.f32 %v1075_v6, %v281_v54 }
 0x621   :  { %v903_v56 = vpop.f32.mrf.mxu0 }
 0x622   :  { %297 = vrot.lane.b32.xlu1 %v282_v55, %s1003_s24  ;;  %v289_v60 = vadd.f32 %v834_v59, %v282_v55 }
 0x623   :  { %v284_v57 = vpop.f32.mrf.mxu0 }
 0x624   :  { %v835_v61 = vmul.f32 -1.442695, %v289_v60 }
 0x625   :  { %v904_v58 = vpop.f32.mrf.mxu0 }
 0x626   :  { %965 = vpow2.f32 %v835_v61 }
 0x633   :  { %v966_v62 = vpop.eup %965 }
 0x634   :  { %v293_v63 = vadd.f32 1.0, %v966_v62 }
 0x636   :  { %967 = vrcp.f32 %v293_v63 }
 0x643   :  { %v968_v3 = vpop.eup %967 }
 0x644   :  { %v307_v10 = vsub.f32 1.0, %v968_v3  ;;  %v313_v12 = vmul.f32 %v968_v3, %v220_v51 }
 0x694   :  { %v298_v4 = vpop.permute.xlu1 %297 }
 0x695   :  { %v300_v5 = vmul.f32 %v968_v3, %v298_v4 }
 0x697   :  { %302 = vrot.lane.b32.xlu0 %v300_v5, %s1003_s24 }
 0x709   :  { %v303_v7 = vpop.permute.xlu0 %302 }
 0x70a   :  { %v305_v8 = vadd.f32 %v834_v59, %v303_v7 }
 0x70c   :  { %969 = vtanh.f32 %v305_v8 }
 0x719   :  { %v970_v9 = vpop.eup %969 }
 0x71a   :  { %309 = vrot.lane.b32.xlu1 %v970_v9, %s1004_s3 }
 0x78c   :  { %v310_v11 = vpop.permute.xlu1 %309 }
 0x78d   :  { %v312_v13 = vmul.f32 %v310_v11, %v307_v10  ;;  %v846_v10 = vld [vmem:[%s1253_s0 + $0xa] sm:$0x3] }
 0x78f   :  { %v314_v14 = vadd.f32 %v313_v12, %v312_v13 }
 0x791   :  { %v1120_v15 = vpack.c.bf16 %v314_v14, %v314_v14 }
 0x793   :  { %336 = vrot.lane.b32.xlu0 %v1120_v15, %s1004_s3 }
 0x805   :  { %v337_v16 = vpop.permute.xlu0 %336 }
 0x806   :  { %910 = vmatmul.mubr.msk.bf16.vlgmr.msra.gmra.mxu1 %vm52_vm2, %v337_v16 }
 0x807   :  { %922 = vmatpush3.bf16.msra.mxu1 %v1041_v1  ;;  %925 = vmatprep.mubr.msk.bf16.mxu1 %vm1002_vm0, %v1001_v0 }
 0x808   :  { %923 = vmatprep.subr.bf16.mxu1 %v1001_v0 }
 0x80b   :  { %924 = vmatpush3.bf16.msra.mxu1 %v1052_v2 }
 0x80c   :  { %937 = vmatprep.subr.bf16.mxu1 %v1001_v0 }
 0x8c6   :  { %v375_v17 = vpop.f32.mrf.mxu1 }
 0x8c7   :  { %v376_v18 = vadd.f32 %v1075_v6, %v375_v17 }
 0x8c8   :  { %v911_v19 = vpop.f32.mrf.mxu1 }
 0x8c9   :  { %391 = vrot.lane.b32.xlu1 %v376_v18, %s1003_s24  ;;  %v383_v23 = vadd.f32 %v838_v22, %v376_v18 }
 0x8ca   :  { %v378_v20 = vpop.f32.mrf.mxu1 }
 0x8cb   :  { %v839_v24 = vmul.f32 -1.442695, %v383_v23 }
 0x8cc   :  { %v912_v21 = vpop.f32.mrf.mxu1 }
 0x8cd   :  { %971 = vpow2.f32 %v839_v24 }
 0x8da   :  { %v972_v25 = vpop.eup %971 }
 0x8db   :  { %v387_v26 = vadd.f32 1.0, %v972_v25 }
 0x8dd   :  { %973 = vrcp.f32 %v387_v26 }
 0x8ea   :  { %v974_v27 = vpop.eup %973 }
 0x8eb   :  { %v401_v34 = vsub.f32 1.0, %v974_v27  ;;  %v407_v36 = vmul.f32 %v974_v27, %v314_v14 }
 0x93b   :  { %v392_v28 = vpop.permute.xlu1 %391 }
 0x93c   :  { %v394_v30 = vmul.f32 %v974_v27, %v392_v28 }
 0x93e   :  { %396 = vrot.lane.b32.xlu0 %v394_v30, %s1003_s24 }
 0x9b0   :  { %v397_v31 = vpop.permute.xlu0 %396 }
 0x9b1   :  { %v399_v32 = vadd.f32 %v838_v22, %v397_v31 }
 0x9b3   :  { %975 = vtanh.f32 %v399_v32  ;;  %v850_v32 = vld [vmem:[%s1253_s0 + $0xc] sm:$0x3] }
 0x9c0   :  { %v976_v33 = vpop.eup %975 }
 0x9c1   :  { %403 = vrot.lane.b32.xlu1 %v976_v33, %s1004_s3 }
 0xa33   :  { %v404_v35 = vpop.permute.xlu1 %403 }
 0xa34   :  { %v406_v37 = vmul.f32 %v404_v35, %v401_v34 }
 0xa36   :  { %v408_v38 = vadd.f32 %v407_v36, %v406_v37 }
 0xa38   :  { %v1138_v39 = vpack.c.bf16 %v408_v38, %v408_v38 }
 0xa3a   :  { %430 = vrot.lane.b32.xlu0 %v1138_v39, %s1004_s3 }
 0xaac   :  { %v431_v40 = vpop.permute.xlu0 %430 }
 0xaad   :  { %918 = vmatmul.mubr.msk.bf16.vlgmr.msra.gmra.mxu0 %vm52_vm2, %v431_v40 }
 0xaae   :  { %930 = vmatpush3.bf16.msra.mxu0 %v1041_v1  ;;  %933 = vmatprep.mubr.msk.bf16.mxu0 %vm1002_vm0, %v1001_v0 }
 0xaaf   :  { %931 = vmatprep.subr.bf16.mxu0 %v1001_v0 }
 0xab2   :  { %932 = vmatpush3.bf16.msra.mxu0 %v1052_v2 }
 0xb6d   :  { %v469_v41 = vpop.f32.mrf.mxu0 }
 0xb6e   :  { %v470_v42 = vadd.f32 %v1075_v6, %v469_v41 }
 0xb6f   :  { %v919_v43 = vpop.f32.mrf.mxu0 }
 0xb70   :  { %485 = vrot.lane.b32.xlu1 %v470_v42, %s1003_s24  ;;  %v477_v47 = vadd.f32 %v842_v46, %v470_v42 }
 0xb71   :  { %v472_v44 = vpop.f32.mrf.mxu0 }
 0xb72   :  { %v843_v48 = vmul.f32 -1.442695, %v477_v47 }
 0xb73   :  { %v920_v45 = vpop.f32.mrf.mxu0 }
 0xb74   :  { %977 = vpow2.f32 %v843_v48 }
 0xb81   :  { %v978_v49 = vpop.eup %977 }
 0xb82   :  { %v481_v50 = vadd.f32 1.0, %v978_v49 }
 0xb84   :  { %979 = vrcp.f32 %v481_v50 }
 0xb91   :  { %v980_v51 = vpop.eup %979 }
 0xb92   :  { %v495_v58 = vsub.f32 1.0, %v980_v51  ;;  %v501_v60 = vmul.f32 %v980_v51, %v408_v38 }
 0xbe2   :  { %v486_v53 = vpop.permute.xlu1 %485 }
 0xbe3   :  { %v488_v54 = vmul.f32 %v980_v51, %v486_v53 }
 0xbe5   :  { %490 = vrot.lane.b32.xlu0 %v488_v54, %s1003_s24 }
 0xc57   :  { %v491_v55 = vpop.permute.xlu0 %490 }
 0xc58   :  { %v493_v56 = vadd.f32 %v842_v46, %v491_v55 }
 0xc5a   :  { %981 = vtanh.f32 %v493_v56 }
 0xc67   :  { %v982_v57 = vpop.eup %981 }
 0xc68   :  { %497 = vrot.lane.b32.xlu1 %v982_v57, %s1004_s3  ;;  %v854_v57 = vld [vmem:[%s1253_s0 + $0xe] sm:$0x3] }
 0xcda   :  { %v498_v59 = vpop.permute.xlu1 %497 }
 0xcdb   :  { %v500_v61 = vmul.f32 %v498_v59, %v495_v58 }
 0xcdd   :  { %v502_v62 = vadd.f32 %v501_v60, %v500_v61 }
 0xcdf   :  { %v1155_v63 = vpack.c.bf16 %v502_v62, %v502_v62 }
 0xce1   :  { %524 = vrot.lane.b32.xlu0 %v1155_v63, %s1004_s3 }
 0xd53   :  { %v525_v3 = vpop.permute.xlu0 %524 }
 0xd54   :  { %926 = vmatmul.mubr.msk.bf16.vlgmr.msra.gmra.mxu1 %vm52_vm2, %v525_v3 }
 0xd55   :  { %938 = vmatpush3.bf16.msra.mxu1 %v1041_v1  ;;  %941 = vmatprep.mubr.msk.bf16.mxu1 %vm1002_vm0, %v1001_v0 }
 0xd56   :  { %939 = vmatprep.subr.bf16.mxu1 %v1001_v0 }
 0xd59   :  { %940 = vmatpush3.bf16.msra.mxu1 %v1052_v2 }
 0xe14   :  { %v563_v4 = vpop.f32.mrf.mxu1 }
 0xe15   :  { %v564_v5 = vadd.f32 %v1075_v6, %v563_v4  ;;  %v132_v4 = vlaneseq }
 0xe16   :  { %v927_v7 = vpop.f32.mrf.mxu1 }
 0xe17   :  { %579 = vrot.lane.b32.xlu1 %v564_v5, %s1003_s24  ;;  %v571_v1 = vadd.f32 %v846_v10, %v564_v5 }
 0xe18   :  { %v566_v8 = vpop.f32.mrf.mxu1 }
 0xe19   :  { %v847_v11 = vmul.f32 -1.442695, %v571_v1 }
 0xe1a   :  { %v928_v9 = vpop.f32.mrf.mxu1 }
 0xe1b   :  { %983 = vpow2.f32 %v847_v11 }
 0xe28   :  { %v984_v12 = vpop.eup %983 }
 0xe29   :  { %v575_v13 = vadd.f32 1.0, %v984_v12 }
 0xe2b   :  { %985 = vrcp.f32 %v575_v13 }
 0xe38   :  { %v986_v0 = vpop.eup %985 }
 0xe39   :  { %v589_v19 = vsub.f32 1.0, %v986_v0  ;;  %v595_v21 = vmul.f32 %v986_v0, %v502_v62  ;;  %v1006_v62 = vmov 1966171168  }
 0xe3a   :  { %v130_v3 = vunpack.c.l.s4 %v1006_v62 }
 0xe3c   :  { %v131_v5 = vunpack.c.0.s8 %v130_v3 }
 0xe89   :  { %v580_v2 = vpop.permute.xlu1 %579 }
 0xe8a   :  { %v582_v14 = vmul.f32 %v986_v0, %v580_v2 }
 0xe8c   :  { %584 = vrot.lane.b32.xlu0 %v582_v14, %s1003_s24 }
 0xefe   :  { %v585_v16 = vpop.permute.xlu0 %584 }
 0xeff   :  { %v587_v17 = vadd.f32 %v846_v10, %v585_v16 }
 0xf01   :  { %987 = vtanh.f32 %v587_v17 }
 0xf0e   :  { %v988_v18 = vpop.eup %987 }
 0xf0f   :  { %591 = vrot.lane.b32.xlu1 %v988_v18, %s1004_s3 }
 0xf81   :  { %v592_v20 = vpop.permute.xlu1 %591 }
 0xf82   :  { %v594_v22 = vmul.f32 %v592_v20, %v589_v19 }
 0xf84   :  { %v596_v23 = vadd.f32 %v595_v21, %v594_v22 }
 0xf86   :  { %v1172_v24 = vpack.c.bf16 %v596_v23, %v596_v23 }
 0xf88   :  { %618 = vrot.lane.b32.xlu0 %v1172_v24, %s1004_s3 }
 0xffa   :  { %v619_v25 = vpop.permute.xlu0 %618 }
 0xffb   :  { %934 = vmatmul.mubr.msk.bf16.vlgmr.msra.gmra.mxu0 %vm52_vm2, %v619_v25 }
0x10bb   :  { %v657_v26 = vpop.f32.mrf.mxu0 }
0x10bc   :  { %v658_v27 = vadd.f32 %v1075_v6, %v657_v26 }
0x10bd   :  { %v935_v28 = vpop.f32.mrf.mxu0 }
0x10be   :  { %673 = vrot.lane.b32.xlu1 %v658_v27, %s1003_s24  ;;  %v665_v33 = vadd.f32 %v850_v32, %v658_v27 }
0x10bf   :  { %v660_v30 = vpop.f32.mrf.mxu0 }
0x10c0   :  { %v851_v34 = vmul.f32 -1.442695, %v665_v33 }
0x10c1   :  { %v936_v31 = vpop.f32.mrf.mxu0 }
0x10c2   :  { %989 = vpow2.f32 %v851_v34 }
0x10cf   :  { %v990_v35 = vpop.eup %989 }
0x10d0   :  { %v669_v36 = vadd.f32 1.0, %v990_v35 }
0x10d2   :  { %991 = vrcp.f32 %v669_v36 }
0x10df   :  { %v992_v37 = vpop.eup %991 }
0x10e0   :  { %v683_v44 = vsub.f32 1.0, %v992_v37  ;;  %v689_v46 = vmul.f32 %v992_v37, %v596_v23 }
0x1130   :  { %v674_v38 = vpop.permute.xlu1 %673 }
0x1131   :  { %v676_v40 = vmul.f32 %v992_v37, %v674_v38 }
0x1133   :  { %678 = vrot.lane.b32.xlu0 %v676_v40, %s1003_s24 }
0x11a5   :  { %v679_v41 = vpop.permute.xlu0 %678 }
0x11a6   :  { %v681_v42 = vadd.f32 %v850_v32, %v679_v41 }
0x11a8   :  { %993 = vtanh.f32 %v681_v42 }
0x11b5   :  { %v994_v43 = vpop.eup %993 }
0x11b6   :  { %685 = vrot.lane.b32.xlu1 %v994_v43, %s1004_s3 }
0x1228   :  { %v686_v45 = vpop.permute.xlu1 %685 }
0x1229   :  { %v688_v47 = vmul.f32 %v686_v45, %v683_v44 }
0x122b   :  { %v1184_v48 = vadd.f32 %v689_v46, %v688_v47 }
0x122d   :  { %v691_v49 = vpack.c.bf16 %v1184_v48, %v1184_v48 }
0x122f   :  { %712 = vrot.lane.b32.xlu0 %v691_v49, %s1004_s3 }
0x12a1   :  { %v713_v50 = vpop.permute.xlu0 %712 }
0x12a2   :  { %942 = vmatmul.mubr.msk.bf16.vlgmr.msra.gmra.mxu1 %vm52_vm2, %v713_v50 }
0x1362   :  { %v751_v51 = vpop.f32.mrf.mxu1 }
0x1363   :  { %v752_v53 = vadd.f32 %v1075_v6, %v751_v51  ;;  %v133_v6 = vshrl.u32 %v132_v4, 7 }
0x1364   :  { %v943_v54 = vpop.f32.mrf.mxu1 }
0x1365   :  { %767 = vrot.lane.b32.xlu1 %v752_v53, %s1003_s24  ;;  %v759_v58 = vadd.f32 %v854_v57, %v752_v53  ;;  %v134_v7 = vsub.s32 %v131_v5, %v133_v6 }
0x1366   :  { %v754_v55 = vpop.f32.mrf.mxu1 }
0x1367   :  { %v855_v59 = vmul.f32 -1.442695, %v759_v58  ;;  %v135_v1 = vrot.slane %v1084_v29, %v134_v7  ;;  %v323_v12 = vrot.slane %v1120_v15, %v134_v7  ;;  %v511_v0 = vrot.slane %v1155_v63, %v134_v7 }
0x1368   :  { %v944_v56 = vpop.f32.mrf.mxu1  ;;  %v699_v14 = vrot.slane %v691_v49, %v134_v7  ;;  %v229_v19 = vrot.slane %v1102_v52, %v134_v7  ;;  %v417_v23 = vrot.slane %v1138_v39, %v134_v7  ;;  %v605_v26 = vrot.slane %v1172_v24, %v134_v7 }
0x1369   :  { %995 = vpow2.f32 %v855_v59  ;;  %v142_v11 = vrot.slane %v135_v1, %v134_v7  ;;  %v330_v13 = vrot.slane %v323_v12, %v134_v7  ;;  %v518_v2 = vrot.slane %v511_v0, %v134_v7 }
0x136a   :  { %v706_v16 = vrot.slane %v699_v14, %v134_v7  ;;  %v236_v22 = vrot.slane %v229_v19, %v134_v7  ;;  %v424_v25 = vrot.slane %v417_v23, %v134_v7  ;;  %v612_v52 = vrot.slane %v605_v26, %v134_v7 }
0x1376   :  { %v996_v60 = vpop.eup %995 }
0x1377   :  { %v763_v61 = vadd.f32 1.0, %v996_v60 }
0x1379   :  { %997 = vrcp.f32 %v763_v61 }
0x1386   :  { %v998_v8 = vpop.eup %997 }
0x1387   :  { %v777_v27 = vsub.f32 1.0, %v998_v8  ;;  %v783_v30 = vmul.f32 %v998_v8, %v1184_v48 }
0x13d7   :  { %v768_v9 = vpop.permute.xlu1 %767 }
0x13d8   :  { %v770_v10 = vmul.f32 %v998_v8, %v768_v9 }
0x13da   :  { %772 = vrot.lane.b32.xlu0 %v770_v10, %s1003_s24 }
0x13de   :  { %143 = vrot.lane.b32.xlu0 %v142_v11, %s1004_s3 }
0x13e2   :  { %331 = vrot.lane.b32.xlu0 %v330_v13, %s1004_s3 }
0x13e6   :  { %519 = vrot.lane.b32.xlu0 %v518_v2, %s1004_s3 }
0x13ea   :  { %707 = vrot.lane.b32.xlu0 %v706_v16, %s1004_s3 }
0x144c   :  { %v773_v29 = vpop.permute.xlu0 %772 }
0x144d   :  { %v775_v17 = vadd.f32 %v854_v57, %v773_v29 }
0x144f   :  { %999 = vtanh.f32 %v775_v17 }
0x1450   :  { %v144_v18 = vpop.permute.xlu0 %143 }
0x1451   :  { %147 = vst.msk [vmem:[%s1254_s4] sm:$0x1] %vm146_vm3, %v144_v18 }
0x1454   :  { %v332_v15 = vpop.permute.xlu0 %331 }
0x1455   :  { %836 = vst.msk [vmem:[%s1254_s4 + $0x2] sm:$0x1] %vm146_vm3, %v332_v15 }
0x1458   :  { %v520_v63 = vpop.permute.xlu0 %519 }
0x1459   :  { %844 = vst.msk [vmem:[%s1254_s4 + $0x4] sm:$0x1] %vm146_vm3, %v520_v63 }
0x145c   :  { %v1000_v20 = vpop.eup %999  ;;  %v708_v21 = vpop.permute.xlu0 %707 }
0x145d   :  { %852 = vst.msk [vmem:[%s1254_s4 + $0x6] sm:$0x1] %vm146_vm3, %v708_v21  ;;  %779 = vrot.lane.b32.xlu1 %v1000_v20, %s1004_s3 }
0x1461   :  { %237 = vrot.lane.b32.xlu1 %v236_v22, %s1004_s3 }
0x1465   :  { %425 = vrot.lane.b32.xlu1 %v424_v25, %s1004_s3 }
0x1469   :  { %613 = vrot.lane.b32.xlu1 %v612_v52, %s1004_s3 }
0x14cf   :  { %v780_v28 = vpop.permute.xlu1 %779 }
0x14d0   :  { %v782_v31 = vmul.f32 %v780_v28, %v777_v27 }
0x14d2   :  { %v784_v32 = vadd.f32 %v783_v30, %v782_v31 }
0x14d3   :  { %v238_v33 = vpop.permute.xlu1 %237 }
0x14d4   :  { %v785_v34 = vpack.c.bf16 %v784_v32, %v784_v32  ;;  %832 = vst.msk [vmem:[%s1254_s4 + $0x1] sm:$0x1] %vm146_vm3, %v238_v33  ;;  %807 = vrot.lane.b32.xlu0 %v784_v32, %s1004_s3 }
0x14d6   :  { %v793_v39 = vrot.slane %v785_v34, %v134_v7 }
0x14d7   :  { %v426_v24 = vpop.permute.xlu1 %425 }
0x14d8   :  { %840 = vst.msk [vmem:[%s1254_s4 + $0x3] sm:$0x1] %vm146_vm3, %v426_v24  ;;  %v800_v35 = vrot.slane %v793_v39, %v134_v7 }
0x14da   :  { %801 = vrot.lane.b32.xlu1 %v800_v35, %s1004_s3 }
0x14db   :  { %v614_v36 = vpop.permute.xlu1 %613 }
0x14dc   :  { %848 = vst.msk [vmem:[%s1254_s4 + $0x5] sm:$0x1] %vm146_vm3, %v614_v36 }
0x1546   :  { %v808_v37 = vpop.permute.xlu0 %807 }
0x1547   :  { %811 = vst.msk [vmem:[#allocation2] sm:$0x3] %vm25_vm1, %v808_v37  ;;  %815 = vst.msk [vmem:[%s1255_s5] sm:$0x3] %vm25_vm1, %v808_v37 }
0x154c   :  { %v802_v38 = vpop.permute.xlu1 %801 }
0x154d   :  { %856 = vst.msk [vmem:[%s1254_s4 + $0x7] sm:$0x1] %vm146_vm3, %v802_v38 }

</bundles_post_ra>
